<compile_context>
chip_gen: v7x
topology: tpu7x:2x2x1
jax: 0.10.0
libtpu: 0.0.40
codegen_flags: <defaults>
</compile_context>

<pallas_src>
import functools

import jax
import jax.numpy as jnp
from jax.experimental import pallas as pl
from jax.experimental.pallas import tpu as pltpu

EPS = 1e-5
_MM_DTYPE = jnp.bfloat16            # MXU operand dtype (accumulate in f32)


def _vmem_limit_bytes():
    """Per-generation scoped-VMEM limit (review item): ~48MiB on v7x (64MiB
    physical), ~96MiB on v5e/v6e (128MiB physical)."""
    try:
        cap = int(pltpu.get_tpu_info().vmem_capacity_bytes)
    except Exception:                                     # pragma: no cover
        cap = 128 * 1024 * 1024
    return int(min(3 * cap // 4, 100 * 1024 * 1024))


# ------------------------------ fused kernel --------------------------------

def _upconv_fused_kernel(xd_ref, skip_ref, wup_ref, bup_ref, wgx_ref, bgx_ref,
                         wpsi_ref, bpsi_ref, wc_ref, bc_ref, wr_ref, br_ref,
                         o_ref, *, ho, wo, f_int, alpha_up, alpha_conv,
                         alpha_ru, eps):
    """Whole UpConv forward for one batch element, fully resident in VMEM.

    Layouts (spatial always on the 128-lane axis):
      * 'cols' layout : (C, ncols), ncols = Ho*(Wo+2); pixel (i,j) -> i*wpad+j,
        2 junk columns per row (kept zero so they double as conv halo).
      * 'pad'  layout : (C, Lp),  Lp = (Ho+3)*(Wo+2); 1-pixel zero halo; pixel
        (i,j) -> cols index + (wpad+1).
    """
    wpad = wo + 2
    ncols = ho * wpad
    lp = (ho + 3) * wpad
    offsets = tuple(di * wpad + dj for di in range(3) for dj in range(3))
    inv_count = 1.0 / float(ho * wo)

    # valid-pixel mask generated in-kernel (no mask DMA)
    lane = jax.lax.broadcasted_iota(jnp.int32, (1, ncols), 1)
    valid = (lane % wpad) < wo
    maskf = valid.astype(jnp.float32)

    def inorm(z):                              # masked InstanceNorm (no affine)
        mu = jnp.sum(z * maskf, axis=1, keepdims=True) * inv_count
        d = (z - mu) * maskf
        var = jnp.sum(d * d, axis=1, keepdims=True) * inv_count
        return (z - mu) * jax.lax.rsqrt(var + eps)

    def prelu_mask(z, alpha):                  # PReLU; junk (halo) columns -> 0
        return jnp.where(valid, jnp.where(z >= 0.0, z, alpha * z), 0.0)

    def pad_cols(z):                           # (C, ncols) -> (C, Lp)
        c = z.shape[0]
        front = jnp.zeros((c, wpad + 1), z.dtype)
        back = jnp.zeros((c, lp - ncols - wpad - 1), z.dtype)
        return jnp.concatenate([front, z, back], axis=1)

    def stack_taps(z_pad):                     # implicit im2col: (C,Lp)->(9C,ncols)
        return jnp.concatenate([z_pad[:, o:o + ncols] for o in offsets],
                               axis=0)

    # ---- self.up : ConvTranspose2d as a dense 3x3 conv over the XLA-dilated
    #      input; single MXU dot with K = 9*Cin.  Then IN -> PReLU. ----------
    up_raw = jnp.dot(wup_ref[...], stack_taps(xd_ref[0]),
                     preferred_element_type=jnp.float32) + bup_ref[...]
    up_f = prelu_mask(inorm(up_raw), alpha_up)               # (Cout, ncols) f32

    # ---- AttentionBlock: W_g / W_x 1x1 convs fused into one block-diag dot,
    #      separate INs, relu-add, psi 1x1 (VPU sublane reduce), IN, sigmoid.
    skip_pad = skip_ref[0]                                   # (Cout, Lp) bf16
    skip_cols = skip_pad[:, wpad + 1:wpad + 1 + ncols]       # junk cols == 0
    upf_bf = up_f.astype(_MM_DTYPE)
    gx = jnp.dot(wgx_ref[...], jnp.concatenate([upf_bf, skip_cols], axis=0),
                 preferred_element_type=jnp.float32) + bgx_ref[...]
    a = jnp.maximum(inorm(gx[:f_int]) + inorm(gx[f_int:]), 0.0)
    psi_pre = jnp.sum(wpsi_ref[...] * a, axis=0, keepdims=True) + bpsi_ref[...]
    psi = jax.nn.sigmoid(inorm(psi_pre))                     # (1, ncols)
    gated = skip_cols.astype(jnp.float32) * psi              # junk cols == 0

    # ---- self.conv[0] : 3x3 conv over cat([up_f, gated]) without ever
    #      materializing the concat; single MXU dot with K = 18*Cout. --------
    k_cat = jnp.concatenate([stack_taps(pad_cols(upf_bf)),
                             stack_taps(pad_cols(gated.astype(_MM_DTYPE)))],
                            axis=0)
    c_raw = jnp.dot(wc_ref[...], k_cat,
                    preferred_element_type=jnp.float32) + bc_ref[...]
    c = prelu_mask(inorm(c_raw), alpha_conv)                 # (Cout, ncols) f32

    # ---- self.conv[1] : ResidualUnit (3x3 conv -> IN -> PReLU) + identity.
    #      c stays in VMEM, the residual add is a plain aligned VPU add. -----
    r_raw = jnp.dot(wr_ref[...], stack_taps(pad_cols(c.astype(_MM_DTYPE))),
                    preferred_element_type=jnp.float32) + br_ref[...]
    o_ref[0] = prelu_mask(inorm(r_raw), alpha_ru) + c


# -------------------------------- wrapper -----------------------------------

def _w3x3_mat(w):
    """(Cout, Cin, 3, 3) -> (Cout, 9*Cin), taps (kh,kw) row-major, tap-major K
    to match the in-kernel stacked-slice operand ordering."""
    return w.transpose(0, 2, 3, 1).reshape(w.shape[0], -1)


def upconv_forward(x_nchw, skip_nchw, p):
    x = x_nchw.astype(jnp.float32)
    skip = skip_nchw.astype(jnp.float32)
    B, Cin, H, W = x.shape
    Cout = p["w_up"].shape[1]
    f_int = p["w_g"].shape[0]
    Ho, Wo = 2 * H, 2 * W
    wpad = Wo + 2
    ncols = Ho * wpad
    Lp = (Ho + 3) * wpad

    # ConvTranspose2d(k=3,s=2,p=1,op=1) == dense 3x3 "valid" conv over the
    # stride-dilated, edge-padded input with the flipped/transposed kernel.
    # The dilation+padding is one XLA lax.pad (interior padding); the extra
    # bottom rows only feed masked junk columns.
    x_dil = jax.lax.pad(x, jnp.array(0.0, x.dtype),
                        ((0, 0, 0), (0, 0, 0), (1, 3, 1), (1, 2, 1)))
    x_dil = x_dil.reshape(B, Cin, Lp).astype(_MM_DTYPE)
    # skip, zero-padded straight into the conv-halo column layout (bf16).
    skip_p = jnp.pad(skip, ((0, 0), (0, 0), (1, 2), (1, 1))
                     ).reshape(B, Cout, Lp).astype(_MM_DTYPE)

    # ---- tiny weight packing (host/XLA side) --------------------------------
    w_eq = jnp.flip(p["w_up"], (2, 3)).transpose(1, 0, 2, 3)   # (Cout,Cin,3,3)
    w_up_mat = _w3x3_mat(w_eq).astype(_MM_DTYPE)               # (Cout, 9*Cin)
    b_up = p["b_up"].reshape(Cout, 1).astype(jnp.float32)

    wg = p["w_g"][:, :, 0, 0]
    wx = p["w_x"][:, :, 0, 0]
    zg = jnp.zeros_like(wg)
    w_gx = jnp.concatenate(                                     # block-diag
        [jnp.concatenate([wg, zg], axis=1),
         jnp.concatenate([zg, wx], axis=1)], axis=0).astype(_MM_DTYPE)
    b_gx = jnp.concatenate([p["b_g"], p["b_x"]]
                           ).reshape(2 * f_int, 1).astype(jnp.float32)
    w_psi = p["w_psi"][:, :, 0, 0].reshape(f_int, 1).astype(jnp.float32)
    b_psi = p["b_psi"].reshape(1, 1).astype(jnp.float32)

    w_conv_mat = jnp.concatenate(                               # (Cout,18*Cout)
        [_w3x3_mat(p["w_conv"][:, :Cout]), _w3x3_mat(p["w_conv"][:, Cout:])],
        axis=1).astype(_MM_DTYPE)
    b_conv = p["b_conv"].reshape(Cout, 1).astype(jnp.float32)
    w_ru_mat = _w3x3_mat(p["w_ru"]).astype(_MM_DTYPE)           # (Cout, 9*Cout)
    b_ru = p["b_ru"].reshape(Cout, 1).astype(jnp.float32)

    kernel = functools.partial(
        _upconv_fused_kernel, ho=Ho, wo=Wo, f_int=f_int,
        alpha_up=float(p["alpha_up"]), alpha_conv=float(p["alpha_conv"]),
        alpha_ru=float(p["alpha_ru"]), eps=EPS)

    def wspec(arr):
        return pl.BlockSpec(arr.shape, lambda b: (0, 0))

    out_cols = pl.pallas_call(
        kernel,
        out_shape=jax.ShapeDtypeStruct((B, Cout, ncols), jnp.float32),
        grid=(B,),
        in_specs=[
            pl.BlockSpec((1, Cin, Lp), lambda b: (b, 0, 0)),
            pl.BlockSpec((1, Cout, Lp), lambda b: (b, 0, 0)),
            wspec(w_up_mat), wspec(b_up),
            wspec(w_gx), wspec(b_gx),
            wspec(w_psi), wspec(b_psi),
            wspec(w_conv_mat), wspec(b_conv),
            wspec(w_ru_mat), wspec(b_ru),
        ],
        out_specs=pl.BlockSpec((1, Cout, ncols), lambda b: (b, 0, 0)),
        compiler_params=pltpu.CompilerParams(
            dimension_semantics=("parallel",),
            vmem_limit_bytes=_vmem_limit_bytes()),
    )(x_dil, skip_p, w_up_mat, b_up, w_gx, b_gx, w_psi, b_psi,
      w_conv_mat, b_conv, w_ru_mat, b_ru)

    # drop the 2 junk columns per row -> NCHW
    return out_cols.reshape(B, Cout, Ho, wpad)[..., :Wo]


def init_params(key, in_ch, out_ch, k=3):
    f_int = in_ch // 2
    keys = jax.random.split(key, 12)

    def rnd(kk, shape, fan_in):
        return jax.random.normal(kk, shape, jnp.float32) / jnp.sqrt(
            jnp.float32(fan_in))

    return dict(
        # ConvTranspose2d weight layout: (Cin, Cout, k, k)
        w_up=rnd(keys[0], (in_ch, out_ch, k, k), in_ch * k * k),
        b_up=rnd(keys[1], (out_ch,), in_ch * k * k),
        # attention 1x1 convs: (Cout, Cin, 1, 1)
        w_g=rnd(keys[2], (f_int, out_ch, 1, 1), out_ch),
        b_g=rnd(keys[3], (f_int,), out_ch),
        w_x=rnd(keys[4], (f_int, out_ch, 1, 1), out_ch),
        b_x=rnd(keys[5], (f_int,), out_ch),
        w_psi=rnd(keys[6], (1, f_int, 1, 1), f_int),
        b_psi=rnd(keys[7], (1,), f_int),
        # main conv + residual-unit conv: (Cout, Cin, k, k)
        w_conv=rnd(keys[8], (out_ch, 2 * out_ch, k, k), 2 * out_ch * k * k),
        b_conv=rnd(keys[9], (out_ch,), 2 * out_ch * k * k),
        w_ru=rnd(keys[10], (out_ch, out_ch, k, k), out_ch * k * k),
        b_ru=rnd(keys[11], (out_ch,), out_ch * k * k),
        # nn.PReLU() default init (one per Convolution module)
        alpha_up=0.25, alpha_conv=0.25, alpha_ru=0.25,
    )


# --------------------- pure-JAX reference (validation) ----------------------

def _instance_norm_ref(x):
    m = jnp.mean(x, axis=(2, 3), keepdims=True)
    v = jnp.mean((x - m) ** 2, axis=(2, 3), keepdims=True)
    return (x - m) * jax.lax.rsqrt(v + EPS)


def _prelu_ref(x, a):
    return jnp.where(x >= 0.0, x, a * x)


def _conv_ref(x, w, b, pad):
    y = jax.lax.conv_general_dilated(
        x.astype(_MM_DTYPE), w.astype(_MM_DTYPE), (1, 1),
        [(pad, pad), (pad, pad)],
        dimension_numbers=("NCHW", "OIHW", "NCHW"),
        preferred_element_type=jnp.float32)
    return y + b.reshape(1, -1, 1, 1)


def _deconv_ref(x, w, b):
    w_eq = jnp.flip(w, (2, 3)).transpose(1, 0, 2, 3)
    y = jax.lax.conv_general_dilated(
        x.astype(_MM_DTYPE), w_eq.astype(_MM_DTYPE), (1, 1),
        [(1, 2), (1, 2)], lhs_dilation=(2, 2),
        dimension_numbers=("NCHW", "OIHW", "NCHW"),
        preferred_element_type=jnp.float32)
    return y + b.reshape(1, -1, 1, 1)


def upconv_reference(x, skip, p):
    up = _prelu_ref(_instance_norm_ref(_deconv_ref(x, p["w_up"], p["b_up"])),
                    p["alpha_up"])
    g1 = _instance_norm_ref(_conv_ref(up, p["w_g"], p["b_g"], 0))
    x1 = _instance_norm_ref(_conv_ref(skip, p["w_x"], p["b_x"], 0))
    a = jnp.maximum(g1 + x1, 0.0)
    psi_pre = jnp.einsum("of,bfhw->bohw", p["w_psi"][:, :, 0, 0], a
                         ) + p["b_psi"].reshape(1, -1, 1, 1)
    psi = jax.nn.sigmoid(_instance_norm_ref(psi_pre))
    gated = skip * psi
    cat = jnp.concatenate([up, gated], axis=1)
    c = _prelu_ref(_instance_norm_ref(
        _conv_ref(cat, p["w_conv"], p["b_conv"], 1)), p["alpha_conv"])
    r = _prelu_ref(_instance_norm_ref(
        _conv_ref(c, p["w_ru"], p["b_ru"], 1)), p["alpha_ru"])
    return r + c


if __name__ == "__main__":
    # UpConv(spatial_dims=2, in_channels=8, out_channels=4, strides=2,
    #        num_res_units=2, kernel_size=3)   (ResidualUnit uses subunits=1)
    B, Cin, Cout, H = 2, 8, 4, 8
    key = jax.random.PRNGKey(0)
    kx, ks, kp = jax.random.split(key, 3)
    x = jax.random.normal(kx, (B, Cin, H, H), jnp.float32)            # NCHW
    skip = jax.random.normal(ks, (B, Cout, 2 * H, 2 * H), jnp.float32)
    params = init_params(kp, Cin, Cout)

    out = jax.block_until_ready(upconv_forward(x, skip, params))
    ref = jax.block_until_ready(upconv_reference(x, skip, params))

    assert out.shape == (B, Cout, 2 * H, 2 * H), out.shape
    assert bool(jnp.all(jnp.isfinite(out)))
    err = float(jnp.max(jnp.abs(out - ref)))
    assert err < 5e-2, f"max abs err vs reference: {err}"
    print("KERNEL_OK")
</pallas_src>

<mosaic_0001>
module attributes {stable_mosaic.version = 11 : i64} {
  func.func @_upconv_fused_kernel(%arg0: i32, %arg1: memref<1x8x342xbf16, #tpu.memory_space<vmem>>, %arg2: memref<1x4x342xbf16, #tpu.memory_space<vmem>>, %arg3: memref<4x72xbf16, #tpu.memory_space<vmem>>, %arg4: memref<4x1xf32, #tpu.memory_space<vmem>>, %arg5: memref<8x8xbf16, #tpu.memory_space<vmem>>, %arg6: memref<8x1xf32, #tpu.memory_space<vmem>>, %arg7: memref<4x1xf32, #tpu.memory_space<vmem>>, %arg8: memref<1x1xf32, #tpu.memory_space<vmem>>, %arg9: memref<4x72xbf16, #tpu.memory_space<vmem>>, %arg10: memref<4x1xf32, #tpu.memory_space<vmem>>, %arg11: memref<4x36xbf16, #tpu.memory_space<vmem>>, %arg12: memref<4x1xf32, #tpu.memory_space<vmem>>, %arg13: memref<1x4x288xf32, #tpu.memory_space<vmem>>) attributes {dimension_semantics = [#tpu.dimension_semantics<parallel>], iteration_bounds = array<i64: 2>, scalar_prefetch = 0 : i64, scratch_operands = 0 : i64, tpu.core_type = #tpu.core_type<tc>, window_params = [{transform_indices = @transform_0, window_bounds = array<i64: 1, 8, 342>}, {transform_indices = @transform_1, window_bounds = array<i64: 1, 4, 342>}, {pipeline_mode = #tpu.pipeline_mode<synchronous>, transform_indices = @transform_2, window_bounds = array<i64: 4, 72>}, {pipeline_mode = #tpu.pipeline_mode<synchronous>, transform_indices = @transform_3, window_bounds = array<i64: 4, 1>}, {pipeline_mode = #tpu.pipeline_mode<synchronous>, transform_indices = @transform_4, window_bounds = array<i64: 8, 8>}, {pipeline_mode = #tpu.pipeline_mode<synchronous>, transform_indices = @transform_5, window_bounds = array<i64: 8, 1>}, {pipeline_mode = #tpu.pipeline_mode<synchronous>, transform_indices = @transform_6, window_bounds = array<i64: 4, 1>}, {pipeline_mode = #tpu.pipeline_mode<synchronous>, transform_indices = @transform_7, window_bounds = array<i64: 1, 1>}, {pipeline_mode = #tpu.pipeline_mode<synchronous>, transform_indices = @transform_8, window_bounds = array<i64: 4, 72>}, {pipeline_mode = #tpu.pipeline_mode<synchronous>, transform_indices = @transform_9, window_bounds = array<i64: 4, 1>}, {pipeline_mode = #tpu.pipeline_mode<synchronous>, transform_indices = @transform_10, window_bounds = array<i64: 4, 36>}, {pipeline_mode = #tpu.pipeline_mode<synchronous>, transform_indices = @transform_11, window_bounds = array<i64: 4, 1>}, {transform_indices = @transform_12, window_bounds = array<i64: 1, 4, 288>}]} {
    %0 = tpu.iota {dimensions = array<i32: 1>} : vector<1x288xi32>
    %c18_i32 = arith.constant 18 : i32
    %c0_i32 = arith.constant 0 : i32
    %1 = arith.cmpi eq, %c18_i32, %c0_i32 : i32
    %c1_i32 = arith.constant 1 : i32
    %2 = arith.select %1, %c1_i32, %c18_i32 : i32
    %3 = vector.broadcast %2 : i32 to vector<1x288xi32>
    %4 = arith.remsi %0, %3 : vector<1x288xi32>
    %c0_i32_0 = arith.constant 0 : i32
    %5 = vector.broadcast %c0_i32_0 : i32 to vector<1x288xi32>
    %6 = arith.cmpi ne, %4, %5 : vector<1x288xi32>
    %c0_i32_1 = arith.constant 0 : i32
    %7 = vector.broadcast %c0_i32_1 : i32 to vector<1x288xi32>
    %8 = arith.cmpi slt, %4, %7 : vector<1x288xi32>
    %c0_i32_2 = arith.constant 0 : i32
    %9 = arith.cmpi slt, %2, %c0_i32_2 : i32
    %10 = vector.broadcast %9 : i1 to vector<1x288xi1>
    %11 = vector.broadcast %10 : vector<1x288xi1> to vector<1x288xi1>
    %12 = arith.xori %8, %11 : vector<1x288xi1>
    %13 = arith.andi %12, %6 : vector<1x288xi1>
    %14 = vector.broadcast %2 : i32 to vector<1x288xi32>
    %15 = arith.addi %4, %14 : vector<1x288xi32>
    %16 = arith.select %13, %15, %4 : vector<1x288xi1>, vector<1x288xi32>
    %c16_i32 = arith.constant 16 : i32
    %17 = vector.broadcast %c16_i32 : i32 to vector<1x288xi32>
    %18 = arith.cmpi slt, %16, %17 : vector<1x288xi32>
    %19 = arith.extui %18 : vector<1x288xi1> to vector<1x288xi32>
    %20 = arith.sitofp %19 : vector<1x288xi32> to vector<1x288xf32>
    %c0 = arith.constant 0 : index
    %c0_3 = arith.constant 0 : index
    %21 = vector.load %arg3[%c0, %c0_3] : memref<4x72xbf16, #tpu.memory_space<vmem>>, vector<4x72xbf16>
    %c0_4 = arith.constant 0 : index
    %c0_5 = arith.constant 0 : index
    %c0_6 = arith.constant 0 : index
    %22 = vector.load %arg1[%c0_4, %c0_5, %c0_6] : memref<1x8x342xbf16, #tpu.memory_space<vmem>>, vector<1x8x342xbf16>
    %23 = vector.shape_cast %22 : vector<1x8x342xbf16> to vector<8x342xbf16>
    %24 = vector.extract_strided_slice %23 {offsets = [0, 0], sizes = [8, 288], strides = [1, 1]} : vector<8x342xbf16> to vector<8x288xbf16>
    %25 = vector.extract_strided_slice %23 {offsets = [0, 1], sizes = [8, 288], strides = [1, 1]} : vector<8x342xbf16> to vector<8x288xbf16>
    %26 = vector.extract_strided_slice %23 {offsets = [0, 2], sizes = [8, 288], strides = [1, 1]} : vector<8x342xbf16> to vector<8x288xbf16>
    %27 = vector.extract_strided_slice %23 {offsets = [0, 18], sizes = [8, 288], strides = [1, 1]} : vector<8x342xbf16> to vector<8x288xbf16>
    %28 = vector.extract_strided_slice %23 {offsets = [0, 19], sizes = [8, 288], strides = [1, 1]} : vector<8x342xbf16> to vector<8x288xbf16>
    %29 = vector.extract_strided_slice %23 {offsets = [0, 20], sizes = [8, 288], strides = [1, 1]} : vector<8x342xbf16> to vector<8x288xbf16>
    %30 = vector.extract_strided_slice %23 {offsets = [0, 36], sizes = [8, 288], strides = [1, 1]} : vector<8x342xbf16> to vector<8x288xbf16>
    %31 = vector.extract_strided_slice %23 {offsets = [0, 37], sizes = [8, 288], strides = [1, 1]} : vector<8x342xbf16> to vector<8x288xbf16>
    %32 = vector.extract_strided_slice %23 {offsets = [0, 38], sizes = [8, 288], strides = [1, 1]} : vector<8x342xbf16> to vector<8x288xbf16>
    %33 = tpu.concatenate %24, %25, %26, %27, %28, %29, %30, %31, %32 in 0 : vector<8x288xbf16>, vector<8x288xbf16>, vector<8x288xbf16>, vector<8x288xbf16>, vector<8x288xbf16>, vector<8x288xbf16>, vector<8x288xbf16>, vector<8x288xbf16>, vector<8x288xbf16> -> vector<72x288xbf16>
    %cst = arith.constant dense<0.000000e+00> : vector<4x288xf32>
    %34 = tpu.matmul %21, %33, %cst {dimension_numbers = #tpu.dot_dimension_numbers<[1], [0], [0], [1], [0, 0, 1, 1], [], []>} : vector<4x72xbf16>, vector<72x288xbf16>, vector<4x288xf32> -> vector<4x288xf32>
    %c0_7 = arith.constant 0 : index
    %c0_8 = arith.constant 0 : index
    %35 = vector.load %arg4[%c0_7, %c0_8] : memref<4x1xf32, #tpu.memory_space<vmem>>, vector<4x1xf32>
    %36 = vector.broadcast %35 : vector<4x1xf32> to vector<4x288xf32>
    %37 = arith.addf %34, %36 : vector<4x288xf32>
    %38 = vector.broadcast %20 : vector<1x288xf32> to vector<4x288xf32>
    %39 = arith.mulf %37, %38 : vector<4x288xf32>
    %cst_9 = arith.constant dense<0.000000e+00> : vector<4xf32>
    %40 = vector.multi_reduction <add>, %39, %cst_9 [1] : vector<4x288xf32> to vector<4xf32>
    %41 = vector.shape_cast %40 : vector<4xf32> to vector<4x1xf32>
    %cst_10 = arith.constant 3.906250e-03 : f32
    %42 = vector.broadcast %cst_10 : f32 to vector<4x1xf32>
    %43 = arith.mulf %41, %42 : vector<4x1xf32>
    %44 = vector.broadcast %43 : vector<4x1xf32> to vector<4x288xf32>
    %45 = arith.subf %37, %44 : vector<4x288xf32>
    %46 = vector.broadcast %20 : vector<1x288xf32> to vector<4x288xf32>
    %47 = arith.mulf %45, %46 : vector<4x288xf32>
    %48 = arith.mulf %47, %47 : vector<4x288xf32>
    %cst_11 = arith.constant dense<0.000000e+00> : vector<4xf32>
    %49 = vector.multi_reduction <add>, %48, %cst_11 [1] : vector<4x288xf32> to vector<4xf32>
    %50 = vector.shape_cast %49 : vector<4xf32> to vector<4x1xf32>
    %cst_12 = arith.constant 3.906250e-03 : f32
    %51 = vector.broadcast %cst_12 : f32 to vector<4x1xf32>
    %52 = arith.mulf %50, %51 : vector<4x1xf32>
    %53 = vector.broadcast %43 : vector<4x1xf32> to vector<4x288xf32>
    %54 = arith.subf %37, %53 : vector<4x288xf32>
    %cst_13 = arith.constant 9.99999974E-6 : f32
    %55 = vector.broadcast %cst_13 : f32 to vector<4x1xf32>
    %56 = arith.addf %52, %55 : vector<4x1xf32>
    %57 = math.rsqrt %56 : vector<4x1xf32>
    %58 = vector.broadcast %57 : vector<4x1xf32> to vector<4x288xf32>
    %59 = arith.mulf %54, %58 : vector<4x288xf32>
    %cst_14 = arith.constant 0.000000e+00 : f32
    %60 = vector.broadcast %cst_14 : f32 to vector<4x288xf32>
    %61 = arith.cmpf oge, %59, %60 : vector<4x288xf32>
    %cst_15 = arith.constant 2.500000e-01 : f32
    %62 = vector.broadcast %cst_15 : f32 to vector<4x288xf32>
    %63 = arith.mulf %62, %59 : vector<4x288xf32>
    %64 = arith.select %61, %59, %63 : vector<4x288xi1>, vector<4x288xf32>
    %cst_16 = arith.constant 0.000000e+00 : f32
    %65 = vector.shape_cast %18 : vector<1x288xi1> to vector<1x288xi1>
    %66 = vector.broadcast %65 : vector<1x288xi1> to vector<4x288xi1>
    %67 = vector.broadcast %cst_16 : f32 to vector<4x288xf32>
    %68 = arith.select %66, %64, %67 : vector<4x288xi1>, vector<4x288xf32>
    %c0_17 = arith.constant 0 : index
    %c0_18 = arith.constant 0 : index
    %c0_19 = arith.constant 0 : index
    %69 = vector.load %arg2[%c0_17, %c0_18, %c0_19] : memref<1x4x342xbf16, #tpu.memory_space<vmem>>, vector<1x4x342xbf16>
    %70 = vector.shape_cast %69 : vector<1x4x342xbf16> to vector<4x342xbf16>
    %71 = vector.extract_strided_slice %70 {offsets = [0, 19], sizes = [4, 288], strides = [1, 1]} : vector<4x342xbf16> to vector<4x288xbf16>
    %72 = arith.truncf %68 : vector<4x288xf32> to vector<4x288xbf16>
    %c0_20 = arith.constant 0 : index
    %c0_21 = arith.constant 0 : index
    %73 = vector.load %arg5[%c0_20, %c0_21] : memref<8x8xbf16, #tpu.memory_space<vmem>>, vector<8x8xbf16>
    %74 = tpu.concatenate %72, %71 in 0 : vector<4x288xbf16>, vector<4x288xbf16> -> vector<8x288xbf16>
    %cst_22 = arith.constant dense<0.000000e+00> : vector<8x288xf32>
    %75 = tpu.matmul %73, %74, %cst_22 {dimension_numbers = #tpu.dot_dimension_numbers<[1], [0], [0], [1], [0, 0, 1, 1], [], []>} : vector<8x8xbf16>, vector<8x288xbf16>, vector<8x288xf32> -> vector<8x288xf32>
    %c0_23 = arith.constant 0 : index
    %c0_24 = arith.constant 0 : index
    %76 = vector.load %arg6[%c0_23, %c0_24] : memref<8x1xf32, #tpu.memory_space<vmem>>, vector<8x1xf32>
    %77 = vector.broadcast %76 : vector<8x1xf32> to vector<8x288xf32>
    %78 = arith.addf %75, %77 : vector<8x288xf32>
    %79 = vector.extract_strided_slice %78 {offsets = [0, 0], sizes = [4, 288], strides = [1, 1]} : vector<8x288xf32> to vector<4x288xf32>
    %80 = vector.broadcast %20 : vector<1x288xf32> to vector<4x288xf32>
    %81 = arith.mulf %79, %80 : vector<4x288xf32>
    %cst_25 = arith.constant dense<0.000000e+00> : vector<4xf32>
    %82 = vector.multi_reduction <add>, %81, %cst_25 [1] : vector<4x288xf32> to vector<4xf32>
    %83 = vector.shape_cast %82 : vector<4xf32> to vector<4x1xf32>
    %cst_26 = arith.constant 3.906250e-03 : f32
    %84 = vector.broadcast %cst_26 : f32 to vector<4x1xf32>
    %85 = arith.mulf %83, %84 : vector<4x1xf32>
    %86 = vector.broadcast %85 : vector<4x1xf32> to vector<4x288xf32>
    %87 = arith.subf %79, %86 : vector<4x288xf32>
    %88 = vector.broadcast %20 : vector<1x288xf32> to vector<4x288xf32>
    %89 = arith.mulf %87, %88 : vector<4x288xf32>
    %90 = arith.mulf %89, %89 : vector<4x288xf32>
    %cst_27 = arith.constant dense<0.000000e+00> : vector<4xf32>
    %91 = vector.multi_reduction <add>, %90, %cst_27 [1] : vector<4x288xf32> to vector<4xf32>
    %92 = vector.shape_cast %91 : vector<4xf32> to vector<4x1xf32>
    %cst_28 = arith.constant 3.906250e-03 : f32
    %93 = vector.broadcast %cst_28 : f32 to vector<4x1xf32>
    %94 = arith.mulf %92, %93 : vector<4x1xf32>
    %95 = vector.broadcast %85 : vector<4x1xf32> to vector<4x288xf32>
    %96 = arith.subf %79, %95 : vector<4x288xf32>
    %cst_29 = arith.constant 9.99999974E-6 : f32
    %97 = vector.broadcast %cst_29 : f32 to vector<4x1xf32>
    %98 = arith.addf %94, %97 : vector<4x1xf32>
    %99 = math.rsqrt %98 : vector<4x1xf32>
    %100 = vector.broadcast %99 : vector<4x1xf32> to vector<4x288xf32>
    %101 = arith.mulf %96, %100 : vector<4x288xf32>
    %102 = vector.extract_strided_slice %78 {offsets = [4, 0], sizes = [4, 288], strides = [1, 1]} : vector<8x288xf32> to vector<4x288xf32>
    %103 = vector.broadcast %20 : vector<1x288xf32> to vector<4x288xf32>
    %104 = arith.mulf %102, %103 : vector<4x288xf32>
    %cst_30 = arith.constant dense<0.000000e+00> : vector<4xf32>
    %105 = vector.multi_reduction <add>, %104, %cst_30 [1] : vector<4x288xf32> to vector<4xf32>
    %106 = vector.shape_cast %105 : vector<4xf32> to vector<4x1xf32>
    %cst_31 = arith.constant 3.906250e-03 : f32
    %107 = vector.broadcast %cst_31 : f32 to vector<4x1xf32>
    %108 = arith.mulf %106, %107 : vector<4x1xf32>
    %109 = vector.broadcast %108 : vector<4x1xf32> to vector<4x288xf32>
    %110 = arith.subf %102, %109 : vector<4x288xf32>
    %111 = vector.broadcast %20 : vector<1x288xf32> to vector<4x288xf32>
    %112 = arith.mulf %110, %111 : vector<4x288xf32>
    %113 = arith.mulf %112, %112 : vector<4x288xf32>
    %cst_32 = arith.constant dense<0.000000e+00> : vector<4xf32>
    %114 = vector.multi_reduction <add>, %113, %cst_32 [1] : vector<4x288xf32> to vector<4xf32>
    %115 = vector.shape_cast %114 : vector<4xf32> to vector<4x1xf32>
    %cst_33 = arith.constant 3.906250e-03 : f32
    %116 = vector.broadcast %cst_33 : f32 to vector<4x1xf32>
    %117 = arith.mulf %115, %116 : vector<4x1xf32>
    %118 = vector.broadcast %108 : vector<4x1xf32> to vector<4x288xf32>
    %119 = arith.subf %102, %118 : vector<4x288xf32>
    %cst_34 = arith.constant 9.99999974E-6 : f32
    %120 = vector.broadcast %cst_34 : f32 to vector<4x1xf32>
    %121 = arith.addf %117, %120 : vector<4x1xf32>
    %122 = math.rsqrt %121 : vector<4x1xf32>
    %123 = vector.broadcast %122 : vector<4x1xf32> to vector<4x288xf32>
    %124 = arith.mulf %119, %123 : vector<4x288xf32>
    %125 = arith.addf %101, %124 : vector<4x288xf32>
    %cst_35 = arith.constant 0.000000e+00 : f32
    %126 = vector.broadcast %cst_35 : f32 to vector<4x288xf32>
    %127 = arith.maximumf %125, %126 : vector<4x288xf32>
    %c0_36 = arith.constant 0 : index
    %c0_37 = arith.constant 0 : index
    %128 = vector.load %arg7[%c0_36, %c0_37] : memref<4x1xf32, #tpu.memory_space<vmem>>, vector<4x1xf32>
    %129 = vector.broadcast %128 : vector<4x1xf32> to vector<4x288xf32>
    %130 = arith.mulf %129, %127 : vector<4x288xf32>
    %cst_38 = arith.constant dense<0.000000e+00> : vector<288xf32>
    %131 = vector.multi_reduction <add>, %130, %cst_38 [0] : vector<4x288xf32> to vector<288xf32>
    %132 = vector.shape_cast %131 : vector<288xf32> to vector<1x288xf32>
    %c0_39 = arith.constant 0 : index
    %c0_40 = arith.constant 0 : index
    %133 = vector.load %arg8[%c0_39, %c0_40] : memref<1x1xf32, #tpu.memory_space<vmem>>, vector<1x1xf32>
    %134 = vector.broadcast %133 : vector<1x1xf32> to vector<1x288xf32>
    %135 = arith.addf %132, %134 : vector<1x288xf32>
    %136 = arith.mulf %135, %20 : vector<1x288xf32>
    %cst_41 = arith.constant dense<0.000000e+00> : vector<1xf32>
    %137 = vector.multi_reduction <add>, %136, %cst_41 [1] : vector<1x288xf32> to vector<1xf32>
    %138 = vector.shape_cast %137 : vector<1xf32> to vector<1x1xf32>
    %cst_42 = arith.constant 3.906250e-03 : f32
    %139 = vector.broadcast %cst_42 : f32 to vector<1x1xf32>
    %140 = arith.mulf %138, %139 : vector<1x1xf32>
    %141 = vector.broadcast %140 : vector<1x1xf32> to vector<1x288xf32>
    %142 = arith.subf %135, %141 : vector<1x288xf32>
    %143 = arith.mulf %142, %20 : vector<1x288xf32>
    %144 = arith.mulf %143, %143 : vector<1x288xf32>
    %cst_43 = arith.constant dense<0.000000e+00> : vector<1xf32>
    %145 = vector.multi_reduction <add>, %144, %cst_43 [1] : vector<1x288xf32> to vector<1xf32>
    %146 = vector.shape_cast %145 : vector<1xf32> to vector<1x1xf32>
    %cst_44 = arith.constant 3.906250e-03 : f32
    %147 = vector.broadcast %cst_44 : f32 to vector<1x1xf32>
    %148 = arith.mulf %146, %147 : vector<1x1xf32>
    %149 = vector.broadcast %140 : vector<1x1xf32> to vector<1x288xf32>
    %150 = arith.subf %135, %149 : vector<1x288xf32>
    %cst_45 = arith.constant 9.99999974E-6 : f32
    %151 = vector.broadcast %cst_45 : f32 to vector<1x1xf32>
    %152 = arith.addf %148, %151 : vector<1x1xf32>
    %153 = math.rsqrt %152 : vector<1x1xf32>
    %154 = vector.broadcast %153 : vector<1x1xf32> to vector<1x288xf32>
    %155 = arith.mulf %150, %154 : vector<1x288xf32>
    %156 = arith.negf %155 : vector<1x288xf32>
    %157 = math.exp %156 : vector<1x288xf32>
    %cst_46 = arith.constant 1.000000e+00 : f32
    %158 = vector.broadcast %cst_46 : f32 to vector<1x288xf32>
    %159 = arith.addf %158, %157 : vector<1x288xf32>
    %160 = arith.divf %158, %159 : vector<1x288xf32>
    %161 = arith.extf %71 : vector<4x288xbf16> to vector<4x288xf32>
    %162 = vector.broadcast %160 : vector<1x288xf32> to vector<4x288xf32>
    %163 = arith.mulf %161, %162 : vector<4x288xf32>
    %cst_47 = arith.constant 0.000000e+00 : bf16
    %164 = vector.broadcast %cst_47 : bf16 to vector<4x19xbf16>
    %cst_48 = arith.constant 0.000000e+00 : bf16
    %165 = vector.broadcast %cst_48 : bf16 to vector<4x35xbf16>
    %166 = tpu.concatenate %164, %72, %165 in 1 : vector<4x19xbf16>, vector<4x288xbf16>, vector<4x35xbf16> -> vector<4x342xbf16>
    %167 = vector.extract_strided_slice %166 {offsets = [0, 0], sizes = [4, 288], strides = [1, 1]} : vector<4x342xbf16> to vector<4x288xbf16>
    %168 = vector.extract_strided_slice %166 {offsets = [0, 1], sizes = [4, 288], strides = [1, 1]} : vector<4x342xbf16> to vector<4x288xbf16>
    %169 = vector.extract_strided_slice %166 {offsets = [0, 2], sizes = [4, 288], strides = [1, 1]} : vector<4x342xbf16> to vector<4x288xbf16>
    %170 = vector.extract_strided_slice %166 {offsets = [0, 18], sizes = [4, 288], strides = [1, 1]} : vector<4x342xbf16> to vector<4x288xbf16>
    %171 = vector.extract_strided_slice %166 {offsets = [0, 19], sizes = [4, 288], strides = [1, 1]} : vector<4x342xbf16> to vector<4x288xbf16>
    %172 = vector.extract_strided_slice %166 {offsets = [0, 20], sizes = [4, 288], strides = [1, 1]} : vector<4x342xbf16> to vector<4x288xbf16>
    %173 = vector.extract_strided_slice %166 {offsets = [0, 36], sizes = [4, 288], strides = [1, 1]} : vector<4x342xbf16> to vector<4x288xbf16>
    %174 = vector.extract_strided_slice %166 {offsets = [0, 37], sizes = [4, 288], strides = [1, 1]} : vector<4x342xbf16> to vector<4x288xbf16>
    %175 = vector.extract_strided_slice %166 {offsets = [0, 38], sizes = [4, 288], strides = [1, 1]} : vector<4x342xbf16> to vector<4x288xbf16>
    %176 = tpu.concatenate %167, %168, %169, %170, %171, %172, %173, %174, %175 in 0 : vector<4x288xbf16>, vector<4x288xbf16>, vector<4x288xbf16>, vector<4x288xbf16>, vector<4x288xbf16>, vector<4x288xbf16>, vector<4x288xbf16>, vector<4x288xbf16>, vector<4x288xbf16> -> vector<36x288xbf16>
    %177 = arith.truncf %163 : vector<4x288xf32> to vector<4x288xbf16>
    %cst_49 = arith.constant 0.000000e+00 : bf16
    %178 = vector.broadcast %cst_49 : bf16 to vector<4x19xbf16>
    %cst_50 = arith.constant 0.000000e+00 : bf16
    %179 = vector.broadcast %cst_50 : bf16 to vector<4x35xbf16>
    %180 = tpu.concatenate %178, %177, %179 in 1 : vector<4x19xbf16>, vector<4x288xbf16>, vector<4x35xbf16> -> vector<4x342xbf16>
    %181 = vector.extract_strided_slice %180 {offsets = [0, 0], sizes = [4, 288], strides = [1, 1]} : vector<4x342xbf16> to vector<4x288xbf16>
    %182 = vector.extract_strided_slice %180 {offsets = [0, 1], sizes = [4, 288], strides = [1, 1]} : vector<4x342xbf16> to vector<4x288xbf16>
    %183 = vector.extract_strided_slice %180 {offsets = [0, 2], sizes = [4, 288], strides = [1, 1]} : vector<4x342xbf16> to vector<4x288xbf16>
    %184 = vector.extract_strided_slice %180 {offsets = [0, 18], sizes = [4, 288], strides = [1, 1]} : vector<4x342xbf16> to vector<4x288xbf16>
    %185 = vector.extract_strided_slice %180 {offsets = [0, 19], sizes = [4, 288], strides = [1, 1]} : vector<4x342xbf16> to vector<4x288xbf16>
    %186 = vector.extract_strided_slice %180 {offsets = [0, 20], sizes = [4, 288], strides = [1, 1]} : vector<4x342xbf16> to vector<4x288xbf16>
    %187 = vector.extract_strided_slice %180 {offsets = [0, 36], sizes = [4, 288], strides = [1, 1]} : vector<4x342xbf16> to vector<4x288xbf16>
    %188 = vector.extract_strided_slice %180 {offsets = [0, 37], sizes = [4, 288], strides = [1, 1]} : vector<4x342xbf16> to vector<4x288xbf16>
    %189 = vector.extract_strided_slice %180 {offsets = [0, 38], sizes = [4, 288], strides = [1, 1]} : vector<4x342xbf16> to vector<4x288xbf16>
    %190 = tpu.concatenate %181, %182, %183, %184, %185, %186, %187, %188, %189 in 0 : vector<4x288xbf16>, vector<4x288xbf16>, vector<4x288xbf16>, vector<4x288xbf16>, vector<4x288xbf16>, vector<4x288xbf16>, vector<4x288xbf16>, vector<4x288xbf16>, vector<4x288xbf16> -> vector<36x288xbf16>
    %191 = tpu.concatenate %176, %190 in 0 : vector<36x288xbf16>, vector<36x288xbf16> -> vector<72x288xbf16>
    %c0_51 = arith.constant 0 : index
    %c0_52 = arith.constant 0 : index
    %192 = vector.load %arg9[%c0_51, %c0_52] : memref<4x72xbf16, #tpu.memory_space<vmem>>, vector<4x72xbf16>
    %cst_53 = arith.constant dense<0.000000e+00> : vector<4x288xf32>
    %193 = tpu.matmul %192, %191, %cst_53 {dimension_numbers = #tpu.dot_dimension_numbers<[1], [0], [0], [1], [0, 0, 1, 1], [], []>} : vector<4x72xbf16>, vector<72x288xbf16>, vector<4x288xf32> -> vector<4x288xf32>
    %c0_54 = arith.constant 0 : index
    %c0_55 = arith.constant 0 : index
    %194 = vector.load %arg10[%c0_54, %c0_55] : memref<4x1xf32, #tpu.memory_space<vmem>>, vector<4x1xf32>
    %195 = vector.broadcast %194 : vector<4x1xf32> to vector<4x288xf32>
    %196 = arith.addf %193, %195 : vector<4x288xf32>
    %197 = vector.broadcast %20 : vector<1x288xf32> to vector<4x288xf32>
    %198 = arith.mulf %196, %197 : vector<4x288xf32>
    %cst_56 = arith.constant dense<0.000000e+00> : vector<4xf32>
    %199 = vector.multi_reduction <add>, %198, %cst_56 [1] : vector<4x288xf32> to vector<4xf32>
    %200 = vector.shape_cast %199 : vector<4xf32> to vector<4x1xf32>
    %cst_57 = arith.constant 3.906250e-03 : f32
    %201 = vector.broadcast %cst_57 : f32 to vector<4x1xf32>
    %202 = arith.mulf %200, %201 : vector<4x1xf32>
    %203 = vector.broadcast %202 : vector<4x1xf32> to vector<4x288xf32>
    %204 = arith.subf %196, %203 : vector<4x288xf32>
    %205 = vector.broadcast %20 : vector<1x288xf32> to vector<4x288xf32>
    %206 = arith.mulf %204, %205 : vector<4x288xf32>
    %207 = arith.mulf %206, %206 : vector<4x288xf32>
    %cst_58 = arith.constant dense<0.000000e+00> : vector<4xf32>
    %208 = vector.multi_reduction <add>, %207, %cst_58 [1] : vector<4x288xf32> to vector<4xf32>
    %209 = vector.shape_cast %208 : vector<4xf32> to vector<4x1xf32>
    %cst_59 = arith.constant 3.906250e-03 : f32
    %210 = vector.broadcast %cst_59 : f32 to vector<4x1xf32>
    %211 = arith.mulf %209, %210 : vector<4x1xf32>
    %212 = vector.broadcast %202 : vector<4x1xf32> to vector<4x288xf32>
    %213 = arith.subf %196, %212 : vector<4x288xf32>
    %cst_60 = arith.constant 9.99999974E-6 : f32
    %214 = vector.broadcast %cst_60 : f32 to vector<4x1xf32>
    %215 = arith.addf %211, %214 : vector<4x1xf32>
    %216 = math.rsqrt %215 : vector<4x1xf32>
    %217 = vector.broadcast %216 : vector<4x1xf32> to vector<4x288xf32>
    %218 = arith.mulf %213, %217 : vector<4x288xf32>
    %cst_61 = arith.constant 0.000000e+00 : f32
    %219 = vector.broadcast %cst_61 : f32 to vector<4x288xf32>
    %220 = arith.cmpf oge, %218, %219 : vector<4x288xf32>
    %cst_62 = arith.constant 2.500000e-01 : f32
    %221 = vector.broadcast %cst_62 : f32 to vector<4x288xf32>
    %222 = arith.mulf %221, %218 : vector<4x288xf32>
    %223 = arith.select %220, %218, %222 : vector<4x288xi1>, vector<4x288xf32>
    %cst_63 = arith.constant 0.000000e+00 : f32
    %224 = vector.shape_cast %18 : vector<1x288xi1> to vector<1x288xi1>
    %225 = vector.broadcast %224 : vector<1x288xi1> to vector<4x288xi1>
    %226 = vector.broadcast %cst_63 : f32 to vector<4x288xf32>
    %227 = arith.select %225, %223, %226 : vector<4x288xi1>, vector<4x288xf32>
    %c0_64 = arith.constant 0 : index
    %c0_65 = arith.constant 0 : index
    %228 = vector.load %arg11[%c0_64, %c0_65] : memref<4x36xbf16, #tpu.memory_space<vmem>>, vector<4x36xbf16>
    %229 = arith.truncf %227 : vector<4x288xf32> to vector<4x288xbf16>
    %cst_66 = arith.constant 0.000000e+00 : bf16
    %230 = vector.broadcast %cst_66 : bf16 to vector<4x19xbf16>
    %cst_67 = arith.constant 0.000000e+00 : bf16
    %231 = vector.broadcast %cst_67 : bf16 to vector<4x35xbf16>
    %232 = tpu.concatenate %230, %229, %231 in 1 : vector<4x19xbf16>, vector<4x288xbf16>, vector<4x35xbf16> -> vector<4x342xbf16>
    %233 = vector.extract_strided_slice %232 {offsets = [0, 0], sizes = [4, 288], strides = [1, 1]} : vector<4x342xbf16> to vector<4x288xbf16>
    %234 = vector.extract_strided_slice %232 {offsets = [0, 1], sizes = [4, 288], strides = [1, 1]} : vector<4x342xbf16> to vector<4x288xbf16>
    %235 = vector.extract_strided_slice %232 {offsets = [0, 2], sizes = [4, 288], strides = [1, 1]} : vector<4x342xbf16> to vector<4x288xbf16>
    %236 = vector.extract_strided_slice %232 {offsets = [0, 18], sizes = [4, 288], strides = [1, 1]} : vector<4x342xbf16> to vector<4x288xbf16>
    %237 = vector.extract_strided_slice %232 {offsets = [0, 19], sizes = [4, 288], strides = [1, 1]} : vector<4x342xbf16> to vector<4x288xbf16>
    %238 = vector.extract_strided_slice %232 {offsets = [0, 20], sizes = [4, 288], strides = [1, 1]} : vector<4x342xbf16> to vector<4x288xbf16>
    %239 = vector.extract_strided_slice %232 {offsets = [0, 36], sizes = [4, 288], strides = [1, 1]} : vector<4x342xbf16> to vector<4x288xbf16>
    %240 = vector.extract_strided_slice %232 {offsets = [0, 37], sizes = [4, 288], strides = [1, 1]} : vector<4x342xbf16> to vector<4x288xbf16>
    %241 = vector.extract_strided_slice %232 {offsets = [0, 38], sizes = [4, 288], strides = [1, 1]} : vector<4x342xbf16> to vector<4x288xbf16>
    %242 = tpu.concatenate %233, %234, %235, %236, %237, %238, %239, %240, %241 in 0 : vector<4x288xbf16>, vector<4x288xbf16>, vector<4x288xbf16>, vector<4x288xbf16>, vector<4x288xbf16>, vector<4x288xbf16>, vector<4x288xbf16>, vector<4x288xbf16>, vector<4x288xbf16> -> vector<36x288xbf16>
    %cst_68 = arith.constant dense<0.000000e+00> : vector<4x288xf32>
    %243 = tpu.matmul %228, %242, %cst_68 {dimension_numbers = #tpu.dot_dimension_numbers<[1], [0], [0], [1], [0, 0, 1, 1], [], []>} : vector<4x36xbf16>, vector<36x288xbf16>, vector<4x288xf32> -> vector<4x288xf32>
    %c0_69 = arith.constant 0 : index
    %c0_70 = arith.constant 0 : index
    %244 = vector.load %arg12[%c0_69, %c0_70] : memref<4x1xf32, #tpu.memory_space<vmem>>, vector<4x1xf32>
    %245 = vector.broadcast %244 : vector<4x1xf32> to vector<4x288xf32>
    %246 = arith.addf %243, %245 : vector<4x288xf32>
    %247 = vector.broadcast %20 : vector<1x288xf32> to vector<4x288xf32>
    %248 = arith.mulf %246, %247 : vector<4x288xf32>
    %cst_71 = arith.constant dense<0.000000e+00> : vector<4xf32>
    %249 = vector.multi_reduction <add>, %248, %cst_71 [1] : vector<4x288xf32> to vector<4xf32>
    %250 = vector.shape_cast %249 : vector<4xf32> to vector<4x1xf32>
    %cst_72 = arith.constant 3.906250e-03 : f32
    %251 = vector.broadcast %cst_72 : f32 to vector<4x1xf32>
    %252 = arith.mulf %250, %251 : vector<4x1xf32>
    %253 = vector.broadcast %252 : vector<4x1xf32> to vector<4x288xf32>
    %254 = arith.subf %246, %253 : vector<4x288xf32>
    %255 = vector.broadcast %20 : vector<1x288xf32> to vector<4x288xf32>
    %256 = arith.mulf %254, %255 : vector<4x288xf32>
    %257 = arith.mulf %256, %256 : vector<4x288xf32>
    %cst_73 = arith.constant dense<0.000000e+00> : vector<4xf32>
    %258 = vector.multi_reduction <add>, %257, %cst_73 [1] : vector<4x288xf32> to vector<4xf32>
    %259 = vector.shape_cast %258 : vector<4xf32> to vector<4x1xf32>
    %cst_74 = arith.constant 3.906250e-03 : f32
    %260 = vector.broadcast %cst_74 : f32 to vector<4x1xf32>
    %261 = arith.mulf %259, %260 : vector<4x1xf32>
    %262 = vector.broadcast %252 : vector<4x1xf32> to vector<4x288xf32>
    %263 = arith.subf %246, %262 : vector<4x288xf32>
    %cst_75 = arith.constant 9.99999974E-6 : f32
    %264 = vector.broadcast %cst_75 : f32 to vector<4x1xf32>
    %265 = arith.addf %261, %264 : vector<4x1xf32>
    %266 = math.rsqrt %265 : vector<4x1xf32>
    %267 = vector.broadcast %266 : vector<4x1xf32> to vector<4x288xf32>
    %268 = arith.mulf %263, %267 : vector<4x288xf32>
    %cst_76 = arith.constant 0.000000e+00 : f32
    %269 = vector.broadcast %cst_76 : f32 to vector<4x288xf32>
    %270 = arith.cmpf oge, %268, %269 : vector<4x288xf32>
    %cst_77 = arith.constant 2.500000e-01 : f32
    %271 = vector.broadcast %cst_77 : f32 to vector<4x288xf32>
    %272 = arith.mulf %271, %268 : vector<4x288xf32>
    %273 = arith.select %270, %268, %272 : vector<4x288xi1>, vector<4x288xf32>
    %cst_78 = arith.constant 0.000000e+00 : f32
    %274 = vector.shape_cast %18 : vector<1x288xi1> to vector<1x288xi1>
    %275 = vector.broadcast %274 : vector<1x288xi1> to vector<4x288xi1>
    %276 = vector.broadcast %cst_78 : f32 to vector<4x288xf32>
    %277 = arith.select %275, %273, %276 : vector<4x288xi1>, vector<4x288xf32>
    %278 = arith.addf %277, %227 : vector<4x288xf32>
    %c0_79 = arith.constant 0 : index
    %c0_80 = arith.constant 0 : index
    %c0_81 = arith.constant 0 : index
    %279 = vector.load %arg13[%c0_79, %c0_80, %c0_81] : memref<1x4x288xf32, #tpu.memory_space<vmem>>, vector<1x4x288xf32>
    %280 = vector.shape_cast %279 : vector<1x4x288xf32> to vector<4x288xf32>
    %281 = vector.shape_cast %278 : vector<4x288xf32> to vector<1x4x288xf32>
    tpu.vector_store %arg13[%c0_79, %c0_80, %c0_81], %281 {strides = array<i32>} : memref<1x4x288xf32, #tpu.memory_space<vmem>>, vector<1x4x288xf32>,
    return
  }
  func.func @transform_0(%arg0: i32) -> (i32, i32, i32) {
    %c0_i32 = arith.constant 0 : i32
    %c0_i32_0 = arith.constant 0 : i32
    %c0_i32_1 = arith.constant 0 : i32
    return %arg0, %c0_i32, %c0_i32_0 : i32, i32, i32
  }
  func.func @transform_1(%arg0: i32) -> (i32, i32, i32) {
    %c0_i32 = arith.constant 0 : i32
    %c0_i32_0 = arith.constant 0 : i32
    %c0_i32_1 = arith.constant 0 : i32
    return %arg0, %c0_i32, %c0_i32_0 : i32, i32, i32
  }
  func.func @transform_2(%arg0: i32) -> (i32, i32) {
    %c0_i32 = arith.constant 0 : i32
    %c0_i32_0 = arith.constant 0 : i32
    %c0_i32_1 = arith.constant 0 : i32
    return %c0_i32, %c0_i32_0 : i32, i32
  }
  func.func @transform_3(%arg0: i32) -> (i32, i32) {
    %c0_i32 = arith.constant 0 : i32
    %c0_i32_0 = arith.constant 0 : i32
    %c0_i32_1 = arith.constant 0 : i32
    return %c0_i32, %c0_i32_0 : i32, i32
  }
  func.func @transform_4(%arg0: i32) -> (i32, i32) {
    %c0_i32 = arith.constant 0 : i32
    %c0_i32_0 = arith.constant 0 : i32
    %c0_i32_1 = arith.constant 0 : i32
    return %c0_i32, %c0_i32_0 : i32, i32
  }
  func.func @transform_5(%arg0: i32) -> (i32, i32) {
    %c0_i32 = arith.constant 0 : i32
    %c0_i32_0 = arith.constant 0 : i32
    %c0_i32_1 = arith.constant 0 : i32
    return %c0_i32, %c0_i32_0 : i32, i32
  }
  func.func @transform_6(%arg0: i32) -> (i32, i32) {
    %c0_i32 = arith.constant 0 : i32
    %c0_i32_0 = arith.constant 0 : i32
    %c0_i32_1 = arith.constant 0 : i32
    return %c0_i32, %c0_i32_0 : i32, i32
  }
  func.func @transform_7(%arg0: i32) -> (i32, i32) {
    %c0_i32 = arith.constant 0 : i32
    %c0_i32_0 = arith.constant 0 : i32
    %c0_i32_1 = arith.constant 0 : i32
    return %c0_i32, %c0_i32_0 : i32, i32
  }
  func.func @transform_8(%arg0: i32) -> (i32, i32) {
    %c0_i32 = arith.constant 0 : i32
    %c0_i32_0 = arith.constant 0 : i32
    %c0_i32_1 = arith.constant 0 : i32
    return %c0_i32, %c0_i32_0 : i32, i32
  }
  func.func @transform_9(%arg0: i32) -> (i32, i32) {
    %c0_i32 = arith.constant 0 : i32
    %c0_i32_0 = arith.constant 0 : i32
    %c0_i32_1 = arith.constant 0 : i32
    return %c0_i32, %c0_i32_0 : i32, i32
  }
  func.func @transform_10(%arg0: i32) -> (i32, i32) {
    %c0_i32 = arith.constant 0 : i32
    %c0_i32_0 = arith.constant 0 : i32
    %c0_i32_1 = arith.constant 0 : i32
    return %c0_i32, %c0_i32_0 : i32, i32
  }
  func.func @transform_11(%arg0: i32) -> (i32, i32) {
    %c0_i32 = arith.constant 0 : i32
    %c0_i32_0 = arith.constant 0 : i32
    %c0_i32_1 = arith.constant 0 : i32
    return %c0_i32, %c0_i32_0 : i32, i32
  }
  func.func @transform_12(%arg0: i32) -> (i32, i32, i32) {
    %c0_i32 = arith.constant 0 : i32
    %c0_i32_0 = arith.constant 0 : i32
    %c0_i32_1 = arith.constant 0 : i32
    return %arg0, %c0_i32, %c0_i32_0 : i32, i32, i32
  }
}

</mosaic_0001>

<bundles_post_ra>
// kernel: tpu_custom_call.1
= control target key start
LH: loop header
LB: loop body
LE: loop exit
PB: predicated region body
PF: predicated region fallthrough
CT: control target
= control target key end

     0   :  { %s3937_s0 = inlined_call_operand.hbm [shape: bf16[2,8,342], index: 0, kind: input, shape index: {}]   ;;  %s3938_s1 = inlined_call_operand.hbm [shape: bf16[2,4,342], index: 1, kind: input, shape index: {}]   ;;  %s3939_s2 = inlined_call_operand.hbm [shape: bf16[4,72], index: 2, kind: input, shape index: {}]   ;;  %s3940_s3 = inlined_call_operand.hbm [shape: f32[4,1], index: 3, kind: input, shape index: {}]   ;;  %s3941_s4 = inlined_call_operand.hbm [shape: bf16[8,8], index: 4, kind: input, shape index: {}]   ;;  %s3942_s5 = inlined_call_operand.hbm [shape: f32[8,1], index: 5, kind: input, shape index: {}]   ;;  %s3943_s6 = inlined_call_operand.hbm [shape: f32[4,1], index: 6, kind: input, shape index: {}]   ;;  %s3944_s7 = inlined_call_operand.<no memory space> [shape: f32[1,1], index: 7, kind: input, shape index: {}]   ;;  %s3945_s8 = inlined_call_operand.hbm [shape: bf16[4,72], index: 8, kind: input, shape index: {}]   ;;  %s3946_s9 = inlined_call_operand.hbm [shape: f32[4,1], index: 9, kind: input, shape index: {}]   ;;  %s3947_s10 = inlined_call_operand.hbm [shape: bf16[4,36], index: 10, kind: input, shape index: {}]   ;;  %s3948_s11 = inlined_call_operand.hbm [shape: f32[4,1], index: 11, kind: input, shape index: {}]   ;;  %s3949_s12 = inlined_call_operand.hbm [shape: f32[2,4,288], index: 12, kind: output, shape index: {}]  }
   0x1   :  { %3964 = sst [smem:[#allocation31_spill]] %s3937_s0  ;;  %v17_v0 = vstv %s3944_s7 }
   0x2   :  { %3965 = sst [smem:[#allocation32_spill]] %s3939_s2  ;;  %18 = vst [vmem:[#allocation2] sm:$0x1] %v17_v0 }
   0x3   :  { %3966 = sst [smem:[#allocation33_spill]] %s3940_s3 }
   0x4   :  { %3967 = sst [smem:[#allocation34_spill]] %s3941_s4 }
   0x5   :  { %3968 = sst [smem:[#allocation35_spill]] %s3942_s5 }
   0x6   :  { %3969 = sst [smem:[#allocation36_spill]] %s3949_s12 }
   0x7   :  { %19 = vsyncpa [#allocation4], 0 }
   0x8   :  { %21 = vsyncpa [#allocation4 + $0x1], 0 }
   0x9   :  { %22 = vsyncpa [#allocation7], 0 }
   0xa   :  { %24 = vsyncpa [#allocation7 + $0x1], 0 }
   0xb   :  { %25 = vsyncpa [#allocation10], 0 }
   0xc   :  { %26 = vsyncpa [#allocation13], 0 }
   0xd   :  { %27 = vsyncpa [#allocation16], 0 }
   0xe   :  { %28 = vsyncpa [#allocation19], 0 }
   0xf   :  { %29 = vsyncpa [#allocation5], 0 }
  0x10   :  { %31 = vsyncpa [#allocation5 + $0x1], 0  ;;  %s2991_s23 = smov 0   ;;  %s2993_s24 = smov 0  }
  0x11   :  { %s2995_s25 = smov 0   ;;  %s2997_s26 = smov 0  }
  0x12 LB: > { %s2898_s7 = smov [#allocation8]   ;;  %s3012_s28 = sadd.s32 4294967295, %s2896_s26   ;;  %s2896_s26 = sphi %s2997_s26, %s4049_s26   ;;  %s2892_s25 = sphi %s2995_s25, %s4048_s25   ;;  %s2888_s24 = sphi %s2993_s24, %s4047_s24   ;;  %s2884_s23 = sphi %s2991_s23, %s4046_s23  }
  0x13   : > { %s343_s27 = sshll.u32 %s2898_s7, 4  ;;  %p2187_p0 = scmp.ge.s32.totalorder %s2896_s26, 1  ;;  %s3017_s27 = int_to_ptr.vmem [resolvable:$true] %s343_s27 }
  0x14   : > { %p3952_p1 = scmp.eq.s32.totalorder %s3012_s28, 0  ;;  %p330_p2 = scmp.lt.s32.totalorder %s2896_s26, 3 }
  0x15   : > { %s2899_s30 = smov [#allocation9]   ;;  %s2900_s14 = smov [#allocation12]  }
  0x16   : > { %p3019_p3 = pnand %p2187_p0, %p330_p2  ;;  %s354_s13 = sshll.u32 %s2899_s30, 4  ;;  %s3026_s13 = int_to_ptr.vmem [resolvable:$true] %s354_s13 }
  0x17   : > { %s376_s15 = sshll.u32 %s2900_s14, 4  ;;  %s2901_s17 = smov [#allocation15]   ;;  %s3034_s15 = int_to_ptr.vmem [resolvable:$true] %s376_s15 }
  0x18   : > { %s3970_s29 = scalar_select %p3019_p3, 1, 0 }
  0x19   : > { %p2351_p5 = pneg %p3019_p3  ;;  %s3036_s18 = sshll.u32 %s2901_s17, 4  ;;  %s402_s18 = int_to_ptr.vmem [resolvable:$true] %s3036_s18 }
  0x1a   : > { %3971 = sst [smem:[#allocation30_spill]] %s3970_s29  ;;  %s3973_s2 = sld [smem:[#allocation32_spill]] }
  0x1b   : > { %p3030_p6 = pnand %p2351_p5, %p3952_p1 }
  0x1d   : > { %p3046_p8 = pneg %p3030_p6 }
  0x20   : > { %s2494_s21 = scalar_lea.hbm %s3973_s2, 32 }
  0x21   : > { %p2495_p7 = scmp.ne.s32.totalorder %s3973_s2, %s2494_s21  ;;  %p2501_p11 = scmp.lt.u32.totalorder %s2494_s21, %s3973_s2 }
  0x23   : > { %p2497_p9 = pnand %p3046_p8, %p2495_p7 }
  0x25   : > { %p2498_p10 = pneg %p2497_p9 }
  0x27   : > { %p2503_p12 = pnand %p2501_p11, %p2498_p10 }
  0x29   : > { %2506 = shalt.err (!%p2503_p12)
}
  0x2a   : > { %s2507_s19 = scalar_lea.vmem %s3017_s27, 32  ;;  %p2515_p5 = scmp.lt.s32.totalorder %s3017_s27, %s3017_s27 }
  0x2b   : > { %p2508_p13 = scmp.ne.s32.totalorder %s3017_s27, %s2507_s19  ;;  %p2516_p4 = scmp.lt.s32.totalorder %s2507_s19, %s2507_s19 }
  0x2d   : > { %p2510_p0 = pnand %p2508_p13, %p3046_p8  ;;  %p2517_p7 = por %p2516_p4, %p2515_p5 }
  0x2f   : > { %p2511_p2 = pneg %p2510_p0 }
  0x31   : > { %p2518_p9 = pnand %p2517_p7, %p2511_p2 }
  0x33   : > { %2521 = shalt.err (!%p2518_p9)
}
  0x34   : > { %2354 = dma.hbm_to_vmem [thread:$0]  (!%p3030_p6), %s3973_s2, 32, %s3017_s27, [#allocation7]  }
  0x35   : > { %s3975_s3 = sld [smem:[#allocation33_spill]] }
  0x3b   : > { %s2522_s14 = scalar_lea.hbm %s3975_s3, 64 }
  0x3c   : > { %p2523_p10 = scmp.ne.s32.totalorder %s3975_s3, %s2522_s14  ;;  %p2529_p12 = scmp.lt.u32.totalorder %s2522_s14, %s3975_s3 }
  0x3e   : > { %p2525_p4 = pnand %p2523_p10, %p3046_p8 }
  0x40   : > { %p2526_p11 = pneg %p2525_p4 }
  0x42   : > { %p2531_p13 = pnand %p2529_p12, %p2526_p11 }
  0x44   : > { %2534 = shalt.err (!%p2531_p13)
}
  0x45   : > { %s2535_s27 = scalar_lea.vmem %s3026_s13, 64  ;;  %p2543_p7 = scmp.lt.s32.totalorder %s3026_s13, %s3026_s13 }
  0x46   : > { %p2536_p0 = scmp.ne.s32.totalorder %s3026_s13, %s2535_s27  ;;  %p2544_p9 = scmp.lt.s32.totalorder %s2535_s27, %s2535_s27 }
  0x48   : > { %p2538_p2 = pnand %p2536_p0, %p3046_p8  ;;  %p2545_p10 = por %p2544_p9, %p2543_p7 }
  0x4a   : > { %p2539_p5 = pneg %p2538_p2 }
  0x4c   : > { %p2546_p4 = pnand %p2545_p10, %p2539_p5 }
  0x4e   : > { %2549 = shalt.err (!%p2546_p4)
}
  0x4f   : > { %2357 = dma.hbm_to_vmem [thread:$0]  (!%p3030_p6), %s3975_s3, 64, %s3026_s13, [#allocation10]  }
  0x50   : > { %s3976_s5 = sld [smem:[#allocation35_spill]] }
  0x56   : > { %s2550_s22 = scalar_lea.hbm %s3976_s5, 128 }
  0x57   : > { %p2551_p11 = scmp.ne.s32.totalorder %s3976_s5, %s2550_s22  ;;  %p2557_p0 = scmp.lt.u32.totalorder %s2550_s22, %s3976_s5 }
  0x59   : > { %p2553_p12 = pnand %p2551_p11, %p3046_p8 }
  0x5b   : > { %p2554_p13 = pneg %p2553_p12 }
  0x5d   : > { %p2559_p2 = pnand %p2557_p0, %p2554_p13 }
  0x5f   : > { %2562 = shalt.err (!%p2559_p2)
}
  0x60   : > { %s2563_s13 = scalar_lea.vmem %s3034_s15, 128  ;;  %p2571_p10 = scmp.lt.s32.totalorder %s3034_s15, %s3034_s15 }
  0x61   : > { %p2564_p5 = scmp.ne.s32.totalorder %s3034_s15, %s2563_s13  ;;  %p2572_p4 = scmp.lt.s32.totalorder %s2563_s13, %s2563_s13 }
  0x63   : > { %p2566_p7 = pnand %p2564_p5, %p3046_p8  ;;  %p2573_p11 = por %p2572_p4, %p2571_p10 }
  0x65   : > { %p2567_p9 = pneg %p2566_p7 }
  0x67   : > { %p2574_p12 = pnand %p2573_p11, %p2567_p9 }
  0x69   : > { %2577 = shalt.err (!%p2574_p12)
}
  0x6a   : > { %2363 = dma.hbm_to_vmem [thread:$0]  (!%p3030_p6), %s3976_s5, 128, %s3034_s15, [#allocation13]  }
  0x6b   : > { %s2902_s29 = smov [#allocation18]   ;;  %s2578_s7 = scalar_lea.hbm %s3945_s8, 32 }
  0x6c   : > { %s423_s20 = sshll.u32 %s2902_s29, 4  ;;  %p2579_p13 = scmp.ne.s32.totalorder %s3945_s8, %s2578_s7  ;;  %s424_s20 = int_to_ptr.vmem [resolvable:$true] %s423_s20 }
  0x6d   : > { %p2585_p5 = scmp.lt.u32.totalorder %s2578_s7, %s3945_s8 }
  0x6e   : > { %p2581_p0 = pnand %p2579_p13, %p3046_p8 }
  0x70   : > { %p2582_p2 = pneg %p2581_p0 }
  0x72   : > { %p2587_p7 = pnand %p2585_p5, %p2582_p2 }
  0x74   : > { %2590 = shalt.err (!%p2587_p7)
}
  0x75   : > { %s2591_s15 = scalar_lea.vmem %s402_s18, 32  ;;  %p2599_p11 = scmp.lt.s32.totalorder %s402_s18, %s402_s18 }
  0x76   : > { %p2592_p9 = scmp.ne.s32.totalorder %s402_s18, %s2591_s15  ;;  %p2600_p12 = scmp.lt.s32.totalorder %s2591_s15, %s2591_s15 }
  0x78   : > { %p2594_p10 = pnand %p2592_p9, %p3046_p8  ;;  %p2601_p1 = por %p2600_p12, %p2599_p11 }
  0x7a   : > { %p2595_p4 = pneg %p2594_p10 }
  0x7c   : > { %p2602_p3 = pnand %p2601_p1, %p2595_p4 }
  0x7e   : > { %2605 = shalt.err (!%p2602_p3)
}
  0x7f   : > { %2369 = dma.hbm_to_vmem [thread:$0]  (!%p3030_p6), %s3945_s8, 32, %s402_s18, [#allocation16]  }
  0x80   : > { %s2606_s22 = scalar_lea.hbm %s3947_s10, 32 }
  0x81   : > { %p2607_p13 = scmp.ne.s32.totalorder %s3947_s10, %s2606_s22  ;;  %p2613_p3 = scmp.lt.u32.totalorder %s2606_s22, %s3947_s10 }
  0x83   : > { %p2609_p0 = pnand %p2607_p13, %p3046_p8 }
  0x85   : > { %p2610_p1 = pneg %p2609_p0 }
  0x87   : > { %p2615_p2 = pnand %p2613_p3, %p2610_p1 }
  0x89   : > { %2618 = shalt.err (!%p2615_p2)
}
  0x8a   : > { %s2619_s13 = scalar_lea.vmem %s424_s20, 32  ;;  %p2627_p10 = scmp.lt.s32.totalorder %s424_s20, %s424_s20 }
  0x8b   : > { %p2620_p5 = scmp.ne.s32.totalorder %s424_s20, %s2619_s13  ;;  %p2628_p4 = scmp.lt.s32.totalorder %s2619_s13, %s2619_s13 }
  0x8d   : > { %p2622_p7 = pnand %p2620_p5, %p3046_p8  ;;  %p2629_p11 = por %p2628_p4, %p2627_p10 }
  0x8f   : > { %p2623_p9 = pneg %p2622_p7 }
  0x91   : > { %p2630_p12 = pnand %p2629_p11, %p2623_p9 }
  0x93   : > { %2633 = shalt.err (!%p2630_p12)
}
  0x94   : > { %2375 = dma.hbm_to_vmem [thread:$0]  (!%p3030_p6), %s3947_s10, 32, %s424_s20, [#allocation19]  }
  0x95   : > { %s2903_s27 = smov [#allocation11]   ;;  %s2904_s29 = smov [#allocation14]  }
  0x96   : > { %s365_s12 = sshll.u32 %s2903_s27, 4  ;;  %s387_s21 = sshll.u32 %s2904_s29, 4  ;;  %s366_s12 = int_to_ptr.vmem [resolvable:$true] %s365_s12  ;;  %s388_s21 = int_to_ptr.vmem [resolvable:$true] %s387_s21 }
  0x97   : > { %s3977_s4 = sld [smem:[#allocation34_spill]] }
  0x9d   : > { %s2634_s14 = scalar_lea.hbm %s3977_s4, 64 }
  0x9e   : > { %p2635_p13 = scmp.ne.s32.totalorder %s3977_s4, %s2634_s14  ;;  %p2641_p3 = scmp.lt.u32.totalorder %s2634_s14, %s3977_s4 }
  0xa0   : > { %p2637_p0 = pnand %p2635_p13, %p3046_p8 }
  0xa2   : > { %p2638_p1 = pneg %p2637_p0 }
  0xa4   : > { %p2643_p2 = pnand %p2641_p3, %p2638_p1 }
  0xa6   : > { %2646 = shalt.err (!%p2643_p2)
}
  0xa7   : > { %s2647_s20 = scalar_lea.vmem %s366_s12, 64  ;;  %p2655_p10 = scmp.lt.s32.totalorder %s366_s12, %s366_s12 }
  0xa8   : > { %p2648_p5 = scmp.ne.s32.totalorder %s366_s12, %s2647_s20  ;;  %p2656_p4 = scmp.lt.s32.totalorder %s2647_s20, %s2647_s20 }
  0xaa   : > { %p2650_p7 = pnand %p2648_p5, %p3046_p8  ;;  %p2657_p11 = por %p2656_p4, %p2655_p10 }
  0xac   : > { %p2651_p9 = pneg %p2650_p7 }
  0xae   : > { %p2658_p12 = pnand %p2657_p11, %p2651_p9 }
  0xb0   : > { %2661 = shalt.err (!%p2658_p12)
}
  0xb1   : > { %2360 = dma.hbm_to_vmem [thread:$0]  (!%p3030_p6), %s3977_s4, 64, %s366_s12, [#allocation10]  }
  0xb2   : > { %s2662_s7 = scalar_lea.hbm %s3943_s6, 64 }
  0xb3   : > { %p2663_p13 = scmp.ne.s32.totalorder %s3943_s6, %s2662_s7  ;;  %p2669_p3 = scmp.lt.u32.totalorder %s2662_s7, %s3943_s6 }
  0xb5   : > { %p2665_p0 = pnand %p2663_p13, %p3046_p8 }
  0xb7   : > { %p2666_p1 = pneg %p2665_p0 }
  0xb9   : > { %p2671_p2 = pnand %p2669_p3, %p2666_p1 }
  0xbb   : > { %2674 = shalt.err (!%p2671_p2)
}
  0xbc   : > { %s2675_s18 = scalar_lea.vmem %s388_s21, 64  ;;  %p2683_p10 = scmp.lt.s32.totalorder %s388_s21, %s388_s21 }
  0xbd   : > { %p2676_p5 = scmp.ne.s32.totalorder %s388_s21, %s2675_s18  ;;  %p2684_p4 = scmp.lt.s32.totalorder %s2675_s18, %s2675_s18 }
  0xbf   : > { %p2678_p7 = pnand %p2676_p5, %p3046_p8  ;;  %p2685_p11 = por %p2684_p4, %p2683_p10 }
  0xc1   : > { %p2679_p9 = pneg %p2678_p7 }
  0xc3   : > { %p2686_p12 = pnand %p2685_p11, %p2679_p9 }
  0xc5   : > { %2689 = shalt.err (!%p2686_p12)
}
  0xc6   : > { %2366 = dma.hbm_to_vmem [thread:$0]  (!%p3030_p6), %s3943_s6, 64, %s388_s21, [#allocation13]  }
  0xc7   : > { %s2905_s15 = smov [#allocation17]   ;;  %s2906_s29 = smov [#allocation20]  }
  0xc8   : > { %s412_s27 = sshll.u32 %s2905_s15, 4  ;;  %s434_s22 = sshll.u32 %s2906_s29, 4  ;;  %s413_s27 = int_to_ptr.vmem [resolvable:$true] %s412_s27  ;;  %s435_s22 = int_to_ptr.vmem [resolvable:$true] %s434_s22 }
  0xc9   : > { %s2690_s17 = scalar_lea.hbm %s3946_s9, 64 }
  0xca   : > { %p2691_p13 = scmp.ne.s32.totalorder %s3946_s9, %s2690_s17  ;;  %p2697_p3 = scmp.lt.u32.totalorder %s2690_s17, %s3946_s9 }
  0xcc   : > { %p2693_p0 = pnand %p2691_p13, %p3046_p8 }
  0xce   : > { %p2694_p1 = pneg %p2693_p0 }
  0xd0   : > { %p2699_p2 = pnand %p2697_p3, %p2694_p1 }
  0xd2   : > { %2702 = shalt.err (!%p2699_p2)
}
  0xd3   : > { %s2703_s21 = scalar_lea.vmem %s413_s27, 64  ;;  %p2711_p10 = scmp.lt.s32.totalorder %s413_s27, %s413_s27 }
  0xd4   : > { %p2704_p5 = scmp.ne.s32.totalorder %s413_s27, %s2703_s21  ;;  %p2712_p4 = scmp.lt.s32.totalorder %s2703_s21, %s2703_s21 }
  0xd6   : > { %p2706_p7 = pnand %p2704_p5, %p3046_p8  ;;  %p2713_p11 = por %p2712_p4, %p2711_p10 }
  0xd8   : > { %p2707_p9 = pneg %p2706_p7 }
  0xda   : > { %p2714_p12 = pnand %p2713_p11, %p2707_p9 }
  0xdc   : > { %2717 = shalt.err (!%p2714_p12)
}
  0xdd   : > { %2372 = dma.hbm_to_vmem [thread:$0]  (!%p3030_p6), %s3946_s9, 64, %s413_s27, [#allocation16]  }
  0xde   : > { %s2718_s14 = scalar_lea.hbm %s3948_s11, 64 }
  0xdf   : > { %p2719_p13 = scmp.ne.s32.totalorder %s3948_s11, %s2718_s14  ;;  %p2725_p3 = scmp.lt.u32.totalorder %s2718_s14, %s3948_s11 }
  0xe1   : > { %p2721_p0 = pnand %p2719_p13, %p3046_p8 }
  0xe3   : > { %p2722_p1 = pneg %p2721_p0 }
  0xe5   : > { %p2727_p2 = pnand %p2725_p3, %p2722_p1 }
  0xe7   : > { %2730 = shalt.err (!%p2727_p2)
}
  0xe8   : > { %s2731_s12 = scalar_lea.vmem %s435_s22, 64  ;;  %p2739_p10 = scmp.lt.s32.totalorder %s435_s22, %s435_s22 }
  0xe9   : > { %p2732_p5 = scmp.ne.s32.totalorder %s435_s22, %s2731_s12  ;;  %p2740_p4 = scmp.lt.s32.totalorder %s2731_s12, %s2731_s12 }
  0xeb   : > { %p2734_p7 = pnand %p2732_p5, %p3046_p8  ;;  %p2741_p11 = por %p2740_p4, %p2739_p10 }
  0xed   : > { %p2735_p9 = pneg %p2734_p7 }
  0xef   : > { %p2742_p12 = pnand %p2741_p11, %p2735_p9 }
  0xf1   : > { %2745 = shalt.err (!%p2742_p12)
}
  0xf2   : > { %2378 = dma.hbm_to_vmem [thread:$0]  (!%p3030_p6), %s3948_s11, 64, %s435_s22, [#allocation19]  }
  0xf3   : > { %s2186_s30 = sadd.s32 4294967294, %s2896_s26   ;;  %s3224_s16 = sadd.s32 1, %s2896_s26  }
  0xf4   : > { %s44_s20 = sadd.s32 1, %s2892_s25  ;;  %s41_s15 = ssub.s32 %s2896_s26, %s3224_s16 }
  0xf5   : > { %p51_p8 = scmp.ne.s32.totalorder %s2892_s25, %s2888_s24  ;;  %p42_p13 = scmp.eq.s32.totalorder %s41_s15, 0 }
  0xf6   : > { %p52_p0 = scmp.eq.s32.totalorder %s2896_s26, 0  ;;  %p57_p1 = scmp.ne.s32.totalorder %s2888_s24, %s2884_s23 }
  0xf7   : > { %p317_p3 = scmp.eq.s32.totalorder %s3012_s28, 1  ;;  %p3978_p5 = scmp.eq.s32.totalorder %s3012_s28, 0 }
  0xf8   : > { %s3236_s29 = scalar_select %p42_p13, %s2892_s25, %s44_s20  }
  0xf9   : > { %p53_p2 = por %p52_p0, %p51_p8  ;;  %p3240_p7 = por %p3978_p5, %p57_p1 }
  0xfa   : > { %p3244_p6 = por %p317_p3, %p51_p8  ;;  %p323_p9 = scmp.eq.s32.totalorder %s2186_s30, 1 }
  0xfb   : > { %s3979_s22 = scalar_select %p3240_p7, 1, 0 }
  0xfc   : > { %s3980_s7 = scalar_select %p3244_p6, 1, 0 }
  0xfd   : > { %p2399_p10 = scmp.lt.s32.totalorder %s2896_s26, 2  ;;  %s3250_s14 = sand.u32 1, %s2892_s25  }
  0xfe   : > { %p3252_p4 = por %p323_p9, %p57_p1  ;;  %s2296_s19 = smul.u32 12, %s3250_s14 }
  0xff   : > { %p3257_p11 = pnand %p2399_p10, %p53_p2  ;;  %s2297_s18 = smul.u32 192, %s2896_s26 }
 0x100   : > { %s3981_s17 = scalar_select %p3252_p4, 1, 0 }
 0x101   : > { %s3983_s0 = sld [smem:[#allocation31_spill]]  ;;  %s449_s30 = scalar_lea.vmem [#allocation3], %s2296_s19 }
 0x102   : > { %s457_s20 = sshll.u32 %s449_s30, 4  ;;  %s464_s15 = sand.u32 1, %s2896_s26   ;;  %s3267_s20 = int_to_ptr.vmem [resolvable:$true] %s457_s20 }
 0x103   : > { %s446_s2 = scalar_lea.sflag [#allocation4], %s3250_s14  ;;  %p2748_p8 = pneg %p3257_p11 }
 0x107   : > { %s3265_s21 = scalar_lea.hbm %s3983_s0, %s2297_s18  ;;  %s2751_s27 = scalar_lea.hbm %s3983_s0, 384 }
 0x108   : > { %s2746_s3 = scalar_lea.hbm %s3265_s21, 192  ;;  %p2752_p1 = scmp.lt.u32.totalorder %s3265_s21, %s3983_s0 }
 0x109   : > { %p2747_p12 = scmp.ne.s32.totalorder %s3265_s21, %s2746_s3  ;;  %p2753_p3 = scmp.lt.u32.totalorder %s2751_s27, %s2746_s3 }
 0x10a   : > { %p2755_p5 = scmp.lt.u32.totalorder %s2746_s3, %s3265_s21 }
 0x10b   : > { %p2749_p13 = pnand %p2748_p8, %p2747_p12  ;;  %p2754_p2 = por %p2753_p3, %p2752_p1 }
 0x10d   : > { %p2750_p0 = pneg %p2749_p13  ;;  %p2756_p9 = por %p2755_p5, %p2754_p2 }
 0x10f   : > { %p2757_p10 = pnand %p2756_p9, %p2750_p0 }
 0x111   : > { %2760 = shalt.err (!%p2757_p10)
}
 0x112   : > { %s2761_s19 = scalar_lea.vmem %s3267_s20, 192  ;;  %s2907_s30 = smov [#allocation3]  }
 0x113   : > { %p2762_p12 = scmp.ne.s32.totalorder %s3267_s20, %s2761_s19  ;;  %s2766_s18 = sshll.u32 %s2907_s30, 4  ;;  %s2767_s18 = int_to_ptr.vmem [resolvable:$false] %s2766_s18 }
 0x114   : > { %s2768_s4 = scalar_lea.vmem %s2767_s18, 384  ;;  %p2769_p6 = scmp.lt.s32.totalorder %s3267_s20, %s2767_s18 }
 0x115   : > { %p2764_p13 = pnand %p2762_p12, %p2748_p8  ;;  %p2770_p1 = scmp.lt.s32.totalorder %s2768_s4, %s2761_s19 }
 0x117   : > { %p2765_p4 = pneg %p2764_p13  ;;  %p2771_p3 = por %p2770_p1, %p2769_p6 }
 0x119   : > { %p2772_p2 = pnand %p2771_p3, %p2765_p4 }
 0x11b   : > { %2775 = shalt.err (!%p2772_p2)
}
 0x11c   : > { %2382 = dma.hbm_to_vmem [thread:$0]  (!%p3257_p11), %s3265_s21, 192, %s3267_s20, %s446_s2  }
 0x11d   : > { %s2298_s3 = smul.u32 6, %s3250_s14  ;;  %s465_s4 = scalar_lea.sflag [#allocation7], %s464_s15 }
 0x11e   : > { %s2299_s5 = smul.u32 96, %s2896_s26  ;;  %s2781_s21 = scalar_lea.hbm %s3938_s1, 192 }
 0x11f   : > { %s468_s19 = scalar_lea.vmem [#allocation6], %s2298_s3 }
 0x120   : > { %s3301_s30 = scalar_lea.hbm %s3938_s1, %s2299_s5  ;;  %s476_s18 = sshll.u32 %s468_s19, 4  ;;  %s477_s18 = int_to_ptr.vmem [resolvable:$true] %s476_s18 }
 0x121   : > { %s2776_s0 = scalar_lea.hbm %s3301_s30, 96  ;;  %p2782_p5 = scmp.lt.u32.totalorder %s3301_s30, %s3938_s1 }
 0x122   : > { %p2777_p6 = scmp.ne.s32.totalorder %s3301_s30, %s2776_s0  ;;  %p2783_p9 = scmp.lt.u32.totalorder %s2781_s21, %s2776_s0 }
 0x123   : > { %p2785_p12 = scmp.lt.u32.totalorder %s2776_s0, %s3301_s30 }
 0x124   : > { %p2779_p4 = pnand %p2777_p6, %p2748_p8  ;;  %p2784_p10 = por %p2783_p9, %p2782_p5 }
 0x126   : > { %p2780_p0 = pneg %p2779_p4  ;;  %p2786_p13 = por %p2785_p12, %p2784_p10 }
 0x128   : > { %p2787_p1 = pnand %p2786_p13, %p2780_p0 }
 0x12a   : > { %2790 = shalt.err (!%p2787_p1)
}
 0x12b   : > { %s2791_s15 = scalar_lea.vmem %s477_s18, 96  ;;  %s2908_s3 = smov [#allocation6]  }
 0x12c   : > { %p2792_p3 = scmp.ne.s32.totalorder %s477_s18, %s2791_s15  ;;  %s2796_s12 = sshll.u32 %s2908_s3, 4  ;;  %s2797_s12 = int_to_ptr.vmem [resolvable:$false] %s2796_s12 }
 0x12d   : > { %s2798_s27 = scalar_lea.vmem %s2797_s12, 192  ;;  %p2799_p4 = scmp.lt.s32.totalorder %s477_s18, %s2797_s12 }
 0x12e   : > { %p2794_p2 = pnand %p2792_p3, %p2748_p8  ;;  %p2800_p7 = scmp.lt.s32.totalorder %s2798_s27, %s2791_s15 }
 0x130   : > { %p2795_p6 = pneg %p2794_p2  ;;  %p2801_p5 = por %p2800_p7, %p2799_p4 }
 0x132   : > { %p2802_p9 = pnand %p2801_p5, %p2795_p6 }
 0x134   : > { %2805 = shalt.err (!%p2802_p9)
}
 0x135   : > { %2385 = dma.hbm_to_vmem [thread:$0]  (!%p3257_p11), %s3301_s30, 96, %s477_s18, %s465_s4  }
 0x136   : > { %s3984_s0 = sld [smem:[#allocation30_spill]] }
 0x13c   : > { %p3985_p0 = scmp.ne.s32.totalorder %s3984_s0, 0 }
 0x13d   : > { %s3327_s19 = sand.u32 (!%p3985_p0), 1, %s2888_s24   ;;  %p3986_p7 = scmp.ne.s32.totalorder (!%p3985_p0), %s3979_s22, 0 }
 0x13e   : > { %485 = sbr.rel (%p3985_p0) target bundleno = 3646 (0xe3e), region = 68  ;;  %s488_s14 = scalar_lea.sflag (!%p3985_p0), [#allocation4], %s3327_s19 }
 0x13f   : > { %s2300_s2 = smul.u32 (!%p3985_p0), 12, %s3327_s19 }
 0x141   : > { %s491_s21 = scalar_lea.vmem (!%p3985_p0), [#allocation3], %s2300_s2 }
 0x145   : > { %2851 = dma.done.wait (%p3986_p7), %s488_s14, 192  }
 0x146   : > { %2853 = vsyncadd (%p3986_p7), %s488_s14, 4294967104  ;;  %s496_s13 = sand.u32 1, %s3012_s28   ;;  %s2301_s30 = smul.u32 6, %s3327_s19 }
 0x147   : > { %s497_s18 = scalar_lea.sflag [#allocation7], %s496_s13 }
 0x148   : > { %s3339_s4 = scalar_lea.vmem [#allocation6], %s2301_s30 }
 0x149   : > { %2855 = dma.done.wait (%p3986_p7), %s497_s18, 96  }
 0x14a   : > { %2857 = vsyncadd (%p3986_p7), %s497_s18, 4294967200  ;;  %p3987_p11 = scmp.eq.s32.totalorder %s3012_s28, 0 }
 0x14c   : > { %2859 = dma.done.wait (%p3987_p11), [#allocation7], 32   ;;  %p3988_p8 = pmov %p3987_p11 }
 0x14e   : > { %2861 = vsyncadd (%p3988_p8), [#allocation7], 4294967264  ;;  %p3989_p10 = pmov %p3988_p8 }
 0x14f   : > { %p3990_p12 = pmov %p3988_p8 }
 0x150   : > { %2863 = dma.done.wait (%p3989_p10), [#allocation10], 128  }
 0x151   : > { %2865 = vsyncadd (%p3990_p12), [#allocation10], 4294967168  ;;  %p3991_p13 = pmov %p3988_p8 }
 0x152   : > { %p3992_p1 = pmov %p3988_p8 }
 0x153   : > { %2867 = dma.done.wait (%p3991_p13), [#allocation13], 192  }
 0x154   : > { %2869 = vsyncadd (%p3992_p1), [#allocation13], 4294967104  ;;  %p3993_p3 = pmov %p3992_p1 }
 0x155   : > { %p3994_p2 = pmov %p3992_p1 }
 0x156   : > { %2871 = dma.done.wait (%p3993_p3), [#allocation16], 96  }
 0x157   : > { %2873 = vsyncadd (%p3994_p2), [#allocation16], 4294967200  ;;  %p3995_p6 = pmov %p3992_p1 }
 0x158   : > { %p3996_p4 = pmov %p3992_p1 }
 0x159   : > { %2875 = dma.done.wait (%p3995_p6), [#allocation19], 96  }
 0x15a   : > { %2877 = vsyncadd (%p3996_p4), [#allocation19], 4294967200  ;;  %v2909_v1 = vmov 0.0   ;;  %v645_v2 = vld [vmem:[%s491_s21] sm:$0xff]  ;;  %s2910_s22 = smov 127   ;;  %s2911_s20 = smov 126   ;;  %v583_v63 = vlaneseq }
 0x15b   : > { %2252 = vmatprep.subr.bf16.mxu1 %v2909_v1  ;;  %v2214_v3 = vcombine.high %v645_v2, %v645_v2  ;;  %v2213_v4 = vcombine.low %v645_v2, %v645_v2  ;;  %v2468_v5 = vld [vmem:[%s491_s21 + $0x8] ss:$0 sps:$4 sm:$0xff]   ;;  %s2912_s5 = smov 110   ;;  %s2913_s15 = smov 109   ;;  %v2917_v6 = vmov 0   ;;  %vm2918_vm0 = vmmov 0  }
 0x15c   : > { %s2914_s3 = smov 108   ;;  %s2915_s12 = smov 92   ;;  %827 = vmatprep.mubr.bf16.mxu0 %v2917_v6  ;;  %2262 = vmatprep.mubr.msk.bf16.mxu1 %vm2918_vm0, %v2909_v1  ;;  %v776_v7 = vld [vmem:[#allocation9] sm:$0xf]  ;;  %vm3963_vm1 = vcmask 1039360   ;;  %vm727_vm2 = vcmask 1043456  }
 0x15d   : > { %657 = vrot.lane.b32.xlu0 %v2214_v3, %s2910_s22  ;;  %655 = vrot.lane.b32.xlu1 %v2213_v4, %s2910_s22  ;;  %s2916_s27 = smov 91   ;;  %s2919_s0 = smov 90   ;;  %vm3962_vm3 = vcmask 1031168   ;;  %vm3961_vm4 = vcmask 900096   ;;  %vm688_vm5 = vcmask 891904   ;;  %vm3960_vm6 = vcmask 883712  }
 0x15e   : > { %2464 = vset.pattern.permute.xlu0 %v2917_v6  ;;  %2465 = vset.pattern.permute.xlu1 %v2917_v6  ;;  %vm3959_vm7 = vcmask 752640   ;;  %vm3958_vm8 = vcmask 744448   ;;  %vm3957_vm9 = vcmask 736256   ;;  %v644_v62 = vld [vmem:[#allocation8] sm:$0x3]  ;;  %vm3956_vm10 = vcmask 588800  }
 0x15f   : > { %v584_v0 = vand.u32 127, %v583_v63  ;;  %s2921_s14 = smov 19   ;;  %s2308_s21 = smul.u32 192, %s3012_s28 }
 0x160   : > { %s581_s13 = scalar_lea.vmem [#allocation21], %s2300_s2  ;;  %s1994_s2 = scalar_lea.sflag [#allocation5], %s3327_s19 }
 0x161   : > { %659 = vrot.lane.b32.xlu0 %v2468_v5, %s2910_s22  ;;  %666 = vrot.lane.b32.xlu1 %v2214_v3, %s2911_s20  ;;  %v586_v2 = vadd.s32 256, %v584_v0  ;;  %s2008_s30 = sshll.u32 %s581_s13, 4  ;;  %p4043_p9 = scmp.ne.s32.totalorder %s3980_s7, 0  ;;  %s3895_s30 = int_to_ptr.vmem [resolvable:$true] %s2008_s30 }
 0x165   : > { %668 = vrot.lane.b32.xlu0 %v2468_v5, %s2911_s20  ;;  %675 = vrot.lane.b32.xlu1 %v2214_v3, %s2912_s5 }
 0x169   : > { %677 = vrot.lane.b32.xlu0 %v2468_v5, %s2912_s5  ;;  %664 = vrot.lane.b32.xlu1 %v2213_v4, %s2911_s20 }
 0x16d   : > { %673 = vrot.lane.b32.xlu0 %v2213_v4, %s2912_s5  ;;  %684 = vrot.lane.b32.xlu1 %v2214_v3, %s2913_s15 }
 0x171   : > { %686 = vrot.lane.b32.xlu0 %v2468_v5, %s2913_s15  ;;  %693 = vrot.lane.b32.xlu1 %v2214_v3, %s2914_s3 }
 0x175   : > { %695 = vrot.lane.b32.xlu0 %v2468_v5, %s2914_s3  ;;  %682 = vrot.lane.b32.xlu1 %v2213_v4, %s2913_s15 }
 0x179   : > { %691 = vrot.lane.b32.xlu0 %v2213_v4, %s2914_s3  ;;  %702 = vrot.lane.b32.xlu1 %v2214_v3, %s2915_s12 }
 0x17d   : > { %704 = vrot.lane.b32.xlu0 %v2468_v5, %s2915_s12  ;;  %711 = vrot.lane.b32.xlu1 %v2214_v3, %s2916_s27 }
 0x181   : > { %713 = vrot.lane.b32.xlu0 %v2468_v5, %s2916_s27  ;;  %700 = vrot.lane.b32.xlu1 %v2213_v4, %s2915_s12 }
 0x185   : > { %709 = vrot.lane.b32.xlu0 %v2213_v4, %s2916_s27  ;;  %718 = vrot.lane.b32.xlu1 %v2213_v4, %s2919_s0 }
 0x189   : > { %720 = vrot.lane.b32.xlu0 %v2214_v3, %s2919_s0  ;;  %722 = vrot.lane.b32.xlu1 %v2468_v5, %s2919_s0 }
 0x18d   : > { %779 = vperm.xlu0 %2464, %v776_v7  }
 0x1cf   : > { %v658_v8 = vpop.permute.xlu0 %657  ;;  %v656_v9 = vpop.permute.xlu1 %655 }
 0x1d0   : > { %v662_v10 = vsel %vm3963_vm1, %v656_v9, %v658_v8 }
 0x1d1   : > { %v730_v16 = vsel %vm727_vm2, %v2213_v4, %v662_v10 }
 0x1d3   : > { %v660_v11 = vpop.permute.xlu0 %659  ;;  %v667_v12 = vpop.permute.xlu1 %666 }
 0x1d4   : > { %v738_v13 = vsel %vm727_vm2, %v2468_v5, %v660_v11  ;;  %v663_v14 = vsel %vm3963_vm1, %v658_v8, %v660_v11  ;;  %v3437_v4 = vmul.u32.u64.low 3817748708, %v584_v0  ;;  %v3438_v5 = vmul.u32.u64.high 3817748708, %v584_v0, %v3437_v4 }
 0x1d5   : > { %2253 = vmatpush3.bf16.msra.mxu1 %v738_v13  ;;  %v734_v15 = vsel %vm727_vm2, %v2214_v3, %v663_v14  ;;  %v585_v3 = vadd.s32 128, %v584_v0  ;;  %v3440_v7 = vmul.u32.u64.low 3817748708, %v586_v2  ;;  %v3441_v8 = vmul.u32.u64.high 3817748708, %v586_v2, %v3440_v7 }
 0x1d6   : > { %795 = vmatprep.subr.bf16.mxu0 %v734_v15  ;;  %2254 = vmatprep.subr.bf16.mxu1 %v2909_v1  ;;  %v593_v11 = vshrl.u32 %v3438_v5, 4 }
 0x1d7   : > { %v669_v17 = vpop.permute.xlu0 %668  ;;  %796 = vmatpush1.bf16.msra.mxu0 %v730_v16  ;;  %v676_v18 = vpop.permute.xlu1 %675  ;;  %v3443_v9 = vmul.u32.u64.low 3817748708, %v585_v3  ;;  %v3444_v10 = vmul.u32.u64.high 3817748708, %v585_v3, %v3443_v9 }
 0x1d8   : > { %v672_v21 = vsel %vm3962_vm3, %v667_v12, %v669_v17  ;;  %v594_v14 = vmul.u32 18, %v593_v11 }
 0x1d9   : > { %v604_v13 = vshrl.u32 %v3444_v10, 4 }
 0x1db   : > { %v678_v19 = vpop.permute.xlu0 %677  ;;  %v665_v20 = vpop.permute.xlu1 %664  ;;  %v605_v16 = vmul.u32 18, %v604_v13 }
 0x1dc   : > { %v681_v22 = vsel %vm3961_vm4, %v676_v18, %v678_v19  ;;  %v750_v23 = vsel %vm727_vm2, %v669_v17, %v678_v19  ;;  %v671_v27 = vsel %vm3962_vm3, %v665_v20, %v667_v12  ;;  %v615_v12 = vshrl.u32 %v3441_v8, 4 }
 0x1dd   : > { %2255 = vmatpush3.bf16.msra.mxu1 %v750_v23  ;;  %v746_v24 = vsel %vm727_vm2, %v672_v21, %v681_v22  ;;  %v595_v17 = vsub.s32 %v584_v0, %v594_v14  ;;  %v606_v19 = vsub.s32 %v585_v3, %v605_v16  ;;  %v965_v16 = vld [vmem:[#allocation12] sm:$0xff] }
 0x1de   : > { %797 = vmatprep.subr.bf16.mxu0 %v746_v24  ;;  %2256 = vmatprep.subr.bf16.mxu1 %v2909_v1  ;;  %v616_v15 = vmul.u32 18, %v615_v12 }
 0x1df   : > { %v674_v25 = vpop.permute.xlu0 %673  ;;  %v685_v26 = vpop.permute.xlu1 %684  ;;  %vm620_vm11 = vcmp.ne.s32.totalorder %v595_v17, 0  ;;  %vm623_vm12 = vcmp.lt.s32.totalorder %v595_v17, 0  ;;  %vm621_vm15 = vcmp.ne.s32.totalorder %v606_v19, 0  ;;  %v629_v20 = vadd.s32 18, %v595_v17 }
 0x1e0   : > { %v680_v28 = vsel %vm3961_vm4, %v674_v25, %v676_v18  ;;  %v617_v18 = vsub.s32 %v586_v2, %v616_v15  ;;  %v630_v22 = vadd.s32 18, %v606_v19 }
 0x1e1   : > { %v742_v29 = vsel %vm727_vm2, %v671_v27, %v680_v28 }
 0x1e2   : > { %798 = vmatpush1.bf16.msra.mxu0 %v742_v29  ;;  %vm622_vm13 = vcmp.ne.s32.totalorder %v617_v18, 0  ;;  %vm625_vm14 = vcmp.lt.s32.totalorder %v617_v18, 0  ;;  %v631_v21 = vadd.s32 18, %v617_v18 }
 0x1e3   : > { %v687_v30 = vpop.permute.xlu0 %686  ;;  %v694_v31 = vpop.permute.xlu1 %693 }
 0x1e4   : > { %v690_v34 = vsel %vm688_vm5, %v685_v26, %v687_v30 }
 0x1e7   : > { %v696_v32 = vpop.permute.xlu0 %695  ;;  %v683_v33 = vpop.permute.xlu1 %682 }
 0x1e8   : > { %v699_v35 = vsel %vm3960_vm6, %v694_v31, %v696_v32  ;;  %v762_v36 = vsel %vm727_vm2, %v687_v30, %v696_v32  ;;  %v689_v40 = vsel %vm688_vm5, %v683_v33, %v685_v26 }
 0x1e9   : > { %2257 = vmatpush3.bf16.msra.mxu1 %v762_v36  ;;  %v758_v37 = vsel %vm727_vm2, %v690_v34, %v699_v35 }
 0x1ea   : > { %799 = vmatprep.subr.bf16.mxu0 %v758_v37  ;;  %2258 = vmatprep.subr.bf16.mxu1 %v2909_v1 }
 0x1eb   : > { %v692_v38 = vpop.permute.xlu0 %691  ;;  %v703_v39 = vpop.permute.xlu1 %702 }
 0x1ec   : > { %v698_v41 = vsel %vm3960_vm6, %v692_v38, %v694_v31 }
 0x1ed   : > { %v754_v42 = vsel %vm727_vm2, %v689_v40, %v698_v41 }
 0x1ee   : > { %800 = vmatpush1.bf16.msra.mxu0 %v754_v42 }
 0x1ef   : > { %v705_v43 = vpop.permute.xlu0 %704  ;;  %v712_v44 = vpop.permute.xlu1 %711 }
 0x1f0   : > { %v708_v47 = vsel %vm3959_vm7, %v703_v39, %v705_v43 }
 0x1f3   : > { %v714_v45 = vpop.permute.xlu0 %713  ;;  %v701_v46 = vpop.permute.xlu1 %700 }
 0x1f4   : > { %v717_v48 = vsel %vm3958_vm8, %v712_v44, %v714_v45  ;;  %v774_v49 = vsel %vm727_vm2, %v705_v43, %v714_v45  ;;  %v707_v53 = vsel %vm3959_vm7, %v701_v46, %v703_v39 }
 0x1f5   : > { %2259 = vmatpush3.bf16.msra.mxu1 %v774_v49  ;;  %v770_v50 = vsel %vm727_vm2, %v708_v47, %v717_v48 }
 0x1f6   : > { %801 = vmatprep.subr.bf16.mxu0 %v770_v50  ;;  %2260 = vmatprep.subr.bf16.mxu1 %v2909_v1 }
 0x1f7   : > { %v710_v51 = vpop.permute.xlu0 %709  ;;  %v719_v52 = vpop.permute.xlu1 %718 }
 0x1f8   : > { %v716_v54 = vsel %vm3958_vm8, %v710_v51, %v712_v44  ;;  %vm628_vm8 = vmand %vm625_vm14, %vm622_vm13  ;;  %vm1095_vm13 = vcmask 1047556   ;;  %vm1099_vm14 = vcmask 261124  }
 0x1f9   : > { %v766_v55 = vsel %vm727_vm2, %v707_v53, %v716_v54  ;;  %v634_v24 = vsel %vm628_vm8, %v631_v21, %v617_v18  ;;  %v2920_v53 = vmov 1983009808  }
 0x1fa   : > { %802 = vmatpush1.bf16.msra.mxu0 %v766_v55  ;;  %vm3453_vm4 = vcmp.lt.s32.totalorder %v634_v24, 16  ;;  %v933_v54 = vunpack.c.l.s4 %v2920_v53  ;;  %v3486_v55 = vshrl.u32 %v583_v63, 7  ;;  %v929_v53 = vld [vmem:[#allocation11] sm:$0xf] }
 0x1fb   : > { %v721_v56 = vpop.permute.xlu0 %720  ;;  %v723_v57 = vpop.permute.xlu1 %722  ;;  %v3469_v36 = vsel %vm3453_vm4, 1.0, %v2909_v1 }
 0x1fc   : > { %v726_v58 = vsel %vm3957_vm9, %v721_v56, %v723_v57  ;;  %v793_v59 = vsel %vm727_vm2, %v723_v57, 0  ;;  %v725_v60 = vsel %vm3957_vm9, %v719_v52, %v721_v56  ;;  %vm626_vm9 = vmand %vm623_vm12, %vm620_vm11  ;;  %v3483_v52 = vld [vmem:[%s3339_s4] sm:$0x3f]  ;;  %v934_v57 = vunpack.c.0.s8 %v933_v54  ;;  %s4042_s4 = sld [smem:[#allocation36_spill]] }
 0x1fd   : > { %2216 = vmatprep.subr.msk.bf16.mxu0 %vm727_vm2, %v726_v58  ;;  %2261 = vmatpush3.bf16.msra.mxu1 %v793_v59  ;;  %v787_v61 = vsel %vm727_vm2, %v725_v60, 0  ;;  %v632_v23 = vsel %vm626_vm9, %v629_v20, %v595_v17  ;;  %v931_v56 = vcombine.low %v3483_v52, %v3483_v52  ;;  %vm955_vm11 = vcmask 1041408  }
 0x1fe   : > { %804 = vmatpush1.bf16.msra.mxu0 %v787_v61  ;;  %2266 = vmatprep.subr.bf16.mxu1 %v2909_v1  ;;  %vm3449_vm6 = vcmp.lt.s32.totalorder %v632_v23, 16  ;;  %v937_v58 = vsub.s32 %v934_v57, %v3486_v55  ;;  %vm971_vm12 = vcmask 64512  }
 0x1ff   : > { %v3464_v31 = vsel %vm3449_vm6, 1.0, %v2909_v1 }
 0x200   : > { %2263 = vmatmul.mubr.msk.bf16.vlgmr.msra.gmra.mrb[0].mxu1 %vm3956_vm10, %v644_v62  ;;  %v938_v59 = vrot.slane %v931_v56, %v937_v58  ;;  %v945_v60 = vrot.slane %v3483_v52, %v937_v58 }
 0x201   : > { %2217 = vmatmul.mubr.msk.bf16.vlgmr.msra.gmra.mrb[0].mxu0 %vm3956_vm10, %v644_v62  ;;  %2268 = vmatprep.mubr.msk.bf16.mxu1 %vm2918_vm0, %v2909_v1  ;;  %vm624_vm10 = vcmp.lt.s32.totalorder %v606_v19, 0 }
 0x202   : > { %1013 = vmatprep.mubr.bf16.mxu0 %v2917_v6  ;;  %vm627_vm7 = vmand %vm624_vm10, %vm621_vm15  ;;  %v946_v15 = vcombine.high %v938_v59, %v938_v59  ;;  %vm1189_vm15 = vcmask 261120  }
 0x203   : > { %v633_v25 = vsel %vm627_vm7, %v630_v22, %v606_v19  ;;  %vm882_vm7 = vcmask 257024  }
 0x204   : > { %vm3457_vm3 = vcmp.lt.s32.totalorder %v633_v25, 16 }
 0x205   : > { %v3474_v37 = vsel %vm3457_vm3, 1.0, %v2909_v1 }
 0x20c   : > { %v780_v26 = vpop.permute.xlu0 %779 }
 0x2d3   : > { %v870_v30 = vpop.f32.mrb[0].mxu1 }
 0x2d4   : > { %v829_v32 = vpop.f32.mrb[0].mxu0  ;;  %v871_v33 = vadd.f32 %v870_v30, %v780_v26  ;;  %v2264_v34 = vpop.f32.mrb[1].mxu1 }
 0x2d5   : > { %v830_v35 = vadd.f32 %v829_v32, %v780_v26  ;;  %v831_v38 = vpop.f32.mrb[1].mxu0  ;;  %v873_v39 = vpop.f32.mrb[2].mxu1 }
 0x2d6   : > { %v832_v40 = vadd.f32 %v831_v38, %v780_v26  ;;  %v833_v41 = vpop.f32.mrb[2].mxu0  ;;  %v2265_v42 = vpop.f32.mrb[3].mxu1  ;;  %v878_v45 = vmul.f32 %v3469_v36, %v871_v33 }
 0x2d7   : > { %v876_v43 = vmul.f32 %v3464_v31, %v830_v35  ;;  %v834_v44 = vpop.f32.mrb[3].mxu0 }
 0x2d8   : > { %v877_v46 = vmul.f32 %v3474_v37, %v832_v40  ;;  %v883_v50 = vsel %vm882_vm7, %v878_v45, 0.0 }
 0x2d9   : > { %v879_v47 = vsel %vm727_vm2, %v876_v43, 0.0 }
 0x2da   : > { %v880_v48 = vsel %vm727_vm2, %v877_v46, 0.0 }
 0x2db   : > { %v881_v49 = vadd.f32 %v880_v48, %v879_v47 }
 0x2dd   : > { %v884_v51 = vadd.f32 %v883_v50, %v881_v49 }
 0x2df   : > { %885 = vadd.xlane.f32.xlu1 %v884_v51 }
 0x2f0   : > { %947 = vrot.lane.b32.xlu1 %v938_v59, %s2913_s15 }
 0x2f4   : > { %951 = vrot.lane.b32.xlu1 %v945_v60, %s2913_s15 }
 0x2f8   : > { %968 = vperm.xlu1 %2465, %v965_v16  }
 0x36c   : > { %v886_v61 = vpop.xlane.xlu1 %885 }
 0x36d   : > { %v887_v62 = vmul.f32 0.00390625, %v886_v61 }
 0x36f   : > { %v888_v0 = vsub.f32 %v830_v35, %v887_v62  ;;  %v889_v2 = vsub.f32 %v832_v40, %v887_v62  ;;  %v890_v3 = vsub.f32 %v871_v33, %v887_v62 }
 0x370   : > { %v948_v20 = vpop.permute.xlu1 %947 }
 0x371   : > { %v891_v63 = vmul.f32 %v3464_v31, %v888_v0  ;;  %v892_v4 = vmul.f32 %v3474_v37, %v889_v2  ;;  %v893_v5 = vmul.f32 %v3469_v36, %v890_v3 }
 0x373   : > { %v894_v7 = vmul.f32 %v891_v63, %v891_v63  ;;  %v895_v8 = vmul.f32 %v892_v4, %v892_v4  ;;  %v896_v9 = vmul.f32 %v893_v5, %v893_v5 }
 0x374   : > { %v952_v30 = vpop.permute.xlu1 %951 }
 0x375   : > { %v897_v10 = vsel %vm727_vm2, %v894_v7, 0.0  ;;  %v898_v11 = vsel %vm727_vm2, %v895_v8, 0.0  ;;  %v900_v13 = vsel %vm882_vm7, %v896_v9, 0.0 }
 0x376   : > { %v899_v12 = vadd.f32 %v898_v11, %v897_v10 }
 0x378   : > { %v901_v14 = vadd.f32 %v900_v13, %v899_v12  ;;  %v969_v54 = vpop.permute.xlu1 %968 }
 0x37a   : > { %902 = vadd.xlane.f32.xlu0 %v901_v14 }
 0x390   : > { %949 = vrot.lane.b32.xlu0 %v946_v15, %s2913_s15 }
 0x407   : > { %v903_v17 = vpop.xlane.xlu0 %902 }
 0x408   : > { %v904_v18 = vmul.f32 0.00390625, %v903_v17 }
 0x40a   : > { %v905_v19 = vadd.f32 1e-05, %v904_v18  ;;  %v1142_v18 = vld [vmem:[#allocation14] sm:$0xf] }
 0x40b   : > { %v950_v33 = vpop.permute.xlu0 %949 }
 0x40c   : > { %2470 = vrsqrt.f32 %v905_v19  ;;  %v954_v43 = vsel %vm688_vm5, %v950_v33, %v952_v30  ;;  %v953_v45 = vsel %vm688_vm5, %v948_v20, %v950_v33 }
 0x416   : > { %v2471_v21 = vpop.eup %2470 }
 0x417   : > { %v907_v22 = vmul.f32 %v2471_v21, %v888_v0  ;;  %v909_v23 = vmul.f32 %v2471_v21, %v890_v3  ;;  %v908_v24 = vmul.f32 %v2471_v21, %v889_v2 }
 0x419   : > { %vm910_vm8 = vcmp.ge.f32.partialorder %v907_v22, 0.0  ;;  %v913_v25 = vmul.f32 0.25, %v907_v22  ;;  %vm912_vm9 = vcmp.ge.f32.partialorder %v909_v23, 0.0  ;;  %v915_v26 = vmul.f32 0.25, %v909_v23 }
 0x41a   : > { %vm911_vm10 = vcmp.ge.f32.partialorder %v908_v24, 0.0  ;;  %v914_v32 = vmul.f32 0.25, %v908_v24 }
 0x41b   : > { %v916_v34 = vsel %vm910_vm8, %v907_v22, %v913_v25  ;;  %v918_v35 = vsel %vm912_vm9, %v909_v23, %v915_v26  ;;  %vm1244_vm8 = vcmask 154624   ;;  %vm1266_vm9 = vcmask 416768  }
 0x41c   : > { %v922_v38 = vsel %vm3449_vm6, %v916_v34, 0.0  ;;  %v924_v39 = vsel %vm3453_vm4, %v918_v35, 0.0  ;;  %v917_v40 = vsel %vm911_vm10, %v908_v24, %v914_v32  ;;  %vm1357_vm10 = vcmask 1045504  }
 0x41d   : > { %v3505_v41 = vpack.c.bf16 %v922_v38, %v922_v38  ;;  %v3507_v42 = vpack.c.bf16 %v924_v39, %v924_v39  ;;  %v923_v44 = vsel %vm3457_vm3, %v917_v40, 0.0 }
 0x41e   : > { %v3513_v46 = vpack.c.bf16 %v923_v44, %v923_v44 }
 0x41f   : > { %v958_v47 = vsel %vm955_vm11, %v3505_v41, %v953_v45  ;;  %v964_v48 = vsel %vm955_vm11, %v3507_v42, %v952_v30 }
 0x420   : > { %v979_v49 = vsel %vm727_vm2, %v964_v48, 0  ;;  %v961_v50 = vsel %vm955_vm11, %v3513_v46, %v954_v43  ;;  %v975_v51 = vsel %vm727_vm2, %v958_v47, 0 }
 0x421   : > { %2219 = vmatprep.subr.msk.bf16.mxu0 %vm727_vm2, %v961_v50  ;;  %2267 = vmatpush3.bf16.msra.mxu1 %v979_v49 }
 0x422   : > { %982 = vmatpush1.bf16.msra.mxu0 %v975_v51  ;;  %2272 = vmatprep.subr.bf16.mxu1 %v2909_v1 }
 0x424   : > { %2269 = vmatmul.mubr.msk.bf16.vlgmr.msra.gmra.mrb[4].mxu1 %vm971_vm12, %v929_v53 }
 0x425   : > { %2220 = vmatmul.mubr.msk.bf16.vlgmr.msra.gmra.mrb[4].mxu0 %vm971_vm12, %v929_v53  ;;  %2282 = vmatprep.mubr.msk.bf16.mxu1 %vm2918_vm0, %v2909_v1  ;;  %vm4003_vm12 = vcmask 1031168  }
 0x426   : > { %1605 = vmatprep.mubr.bf16.mxu0 %v2917_v6 }
 0x4f7   : > { %v1056_v56 = vpop.f32.mrb[4].mxu1 }
 0x4f8   : > { %v1015_v57 = vpop.f32.mrb[4].mxu0  ;;  %v1057_v58 = vadd.f32 %v1056_v56, %v969_v54  ;;  %v2270_v59 = vpop.f32.mrb[5].mxu1 }
 0x4f9   : > { %v1017_v60 = vpop.f32.mrb[5].mxu0  ;;  %v1016_v61 = vadd.f32 %v1015_v57, %v969_v54  ;;  %v1059_v62 = vpop.f32.mrb[6].mxu1 }
 0x4fa   : > { %v1018_v0 = vadd.f32 %v1017_v60, %v969_v54  ;;  %v1019_v2 = vpop.f32.mrb[6].mxu0  ;;  %v2271_v3 = vpop.f32.mrb[7].mxu1  ;;  %v1064_v7 = vmul.f32 %v3469_v36, %v1057_v58  ;;  %v1172_v62 = vld [vmem:[#allocation2] sm:$0x1] }
 0x4fb   : > { %v1020_v63 = vpop.f32.mrb[7].mxu0  ;;  %v1062_v4 = vmul.f32 %v3464_v31, %v1016_v61 }
 0x4fc   : > { %v1063_v5 = vmul.f32 %v3474_v37, %v1018_v0  ;;  %v1100_v14 = vsel %vm1099_vm14, %v1064_v7, 0.0  ;;  %v1068_v15 = vsel %vm882_vm7, %v1064_v7, 0.0 }
 0x4fd   : > { %v1096_v8 = vsel %vm1095_vm13, %v1062_v4, 0.0  ;;  %v1065_v9 = vsel %vm727_vm2, %v1062_v4, 0.0 }
 0x4fe   : > { %v1097_v10 = vsel %vm1095_vm13, %v1063_v5, 0.0  ;;  %v1066_v11 = vsel %vm727_vm2, %v1063_v5, 0.0 }
 0x4ff   : > { %v1098_v12 = vadd.f32 %v1097_v10, %v1096_v8  ;;  %v1067_v13 = vadd.f32 %v1066_v11, %v1065_v9 }
 0x501   : > { %v1101_v16 = vadd.f32 %v1100_v14, %v1098_v12  ;;  %v1069_v17 = vadd.f32 %v1068_v15, %v1067_v13 }
 0x503   : > { %1102 = vadd.xlane.f32.xlu0 %v1101_v16  ;;  %1070 = vadd.xlane.f32.xlu1 %v1069_v17 }
 0x514   : > { %1145 = vperm.xlu1 %2465, %v1142_v18  }
 0x590   : > { %v1103_v19 = vpop.xlane.xlu0 %1102  ;;  %v1071_v20 = vpop.xlane.xlu1 %1070 }
 0x591   : > { %v1104_v21 = vmul.f32 0.00390625, %v1103_v19  ;;  %v1072_v22 = vmul.f32 0.00390625, %v1071_v20 }
 0x593   : > { %v1105_v23 = vsub.f32 %v1016_v61, %v1104_v21  ;;  %v1106_v24 = vsub.f32 %v1018_v0, %v1104_v21  ;;  %v1107_v25 = vsub.f32 %v1057_v58, %v1104_v21  ;;  %v1073_v26 = vsub.f32 %v1016_v61, %v1072_v22 }
 0x594   : > { %v1074_v30 = vsub.f32 %v1018_v0, %v1072_v22  ;;  %v1075_v32 = vsub.f32 %v1057_v58, %v1072_v22 }
 0x595   : > { %v1108_v33 = vmul.f32 %v3464_v31, %v1105_v23  ;;  %v1109_v34 = vmul.f32 %v3474_v37, %v1106_v24  ;;  %v1110_v35 = vmul.f32 %v3469_v36, %v1107_v25  ;;  %v1076_v38 = vmul.f32 %v3464_v31, %v1073_v26 }
 0x596   : > { %v1077_v39 = vmul.f32 %v3474_v37, %v1074_v30  ;;  %v1078_v40 = vmul.f32 %v3469_v36, %v1075_v32 }
 0x597   : > { %v1111_v43 = vmul.f32 %v1108_v33, %v1108_v33  ;;  %v1112_v44 = vmul.f32 %v1109_v34, %v1109_v34  ;;  %v1113_v45 = vmul.f32 %v1110_v35, %v1110_v35  ;;  %v1079_v47 = vmul.f32 %v1076_v38, %v1076_v38  ;;  %v1146_v34 = vpop.permute.xlu1 %1145 }
 0x598   : > { %v1080_v48 = vmul.f32 %v1077_v39, %v1077_v39  ;;  %v1081_v57 = vmul.f32 %v1078_v40, %v1078_v40 }
 0x599   : > { %v1114_v49 = vsel %vm1095_vm13, %v1111_v43, 0.0  ;;  %v1115_v50 = vsel %vm1095_vm13, %v1112_v44, 0.0  ;;  %v1082_v51 = vsel %vm727_vm2, %v1079_v47, 0.0  ;;  %v1117_v56 = vsel %vm1099_vm14, %v1113_v45, 0.0  ;;  %vm4005_vm14 = vmmov %vm4003_vm12 }
 0x59a   : > { %v1116_v53 = vadd.f32 %v1115_v50, %v1114_v49  ;;  %v1083_v54 = vsel %vm727_vm2, %v1080_v48, 0.0  ;;  %v1085_v60 = vsel %vm882_vm7, %v1081_v57, 0.0  ;;  %v1180_v49 = vsub.s32 0, %v3486_v55 }
 0x59b   : > { %v1084_v59 = vadd.f32 %v1083_v54, %v1082_v51  ;;  %vm4004_vm13 = vcmask 900096  }
 0x59c   : > { %v1118_v58 = vadd.f32 %v1117_v56, %v1116_v53 }
 0x59d   : > { %v1086_v61 = vadd.f32 %v1085_v60, %v1084_v59 }
 0x59e   : > { %1119 = vadd.xlane.f32.xlu0 %v1118_v58 }
 0x5a2   : > { %1087 = vadd.xlane.f32.xlu0 %v1086_v61 }
 0x5b8   : > { %1175 = vperm.xlu0 %2464, %v1172_v62  }
 0x62b   : > { %v1120_v0 = vpop.xlane.xlu0 %1119 }
 0x62c   : > { %v1121_v2 = vmul.f32 0.00390625, %v1120_v0 }
 0x62e   : > { %v1122_v3 = vadd.f32 1e-05, %v1121_v2 }
 0x62f   : > { %v1088_v63 = vpop.xlane.xlu0 %1087 }
 0x630   : > { %2472 = vrsqrt.f32 %v1122_v3  ;;  %v1089_v4 = vmul.f32 0.00390625, %v1088_v63 }
 0x632   : > { %v1090_v5 = vadd.f32 1e-05, %v1089_v4 }
 0x634   : > { %2474 = vrsqrt.f32 %v1090_v5 }
 0x637   : > { %v1176_v54 = vpop.permute.xlu0 %1175 }
 0x638   : > { %v1181_v62 = vrot.slane %v1176_v54, %v1180_v49 }
 0x63a   : > { %v2473_v7 = vpop.eup %2472 }
 0x63b   : > { %v1124_v8 = vmul.f32 %v2473_v7, %v1105_v23  ;;  %v1125_v9 = vmul.f32 %v2473_v7, %v1106_v24  ;;  %v1126_v10 = vmul.f32 %v2473_v7, %v1107_v25 }
 0x63d   : > { %v1130_v12 = vrot.slane %v1124_v8, 4  ;;  %v1131_v13 = vrot.slane %v1125_v9, 4  ;;  %v1132_v17 = vrot.slane %v1126_v10, 4 }
 0x63e   : > { %v2475_v11 = vpop.eup %2474 }
 0x63f   : > { %v1092_v14 = vmul.f32 %v2475_v11, %v1073_v26  ;;  %v1093_v15 = vmul.f32 %v2475_v11, %v1074_v30  ;;  %v1094_v16 = vmul.f32 %v2475_v11, %v1075_v32 }
 0x641   : > { %v1136_v18 = vadd.f32 %v1130_v12, %v1092_v14  ;;  %v1137_v19 = vadd.f32 %v1131_v13, %v1093_v15  ;;  %v1138_v20 = vadd.f32 %v1132_v17, %v1094_v16 }
 0x643   : > { %v1139_v21 = vmax.f32 %v1136_v18, 0.0  ;;  %v1140_v22 = vmax.f32 %v1137_v19, 0.0  ;;  %v1141_v33 = vmax.f32 %v1138_v20, 0.0 }
 0x645   : > { %v1148_v35 = vmul.f32 %v1146_v34, %v1139_v21  ;;  %v1149_v38 = vmul.f32 %v1146_v34, %v1140_v22  ;;  %v1150_v39 = vmul.f32 %v1146_v34, %v1141_v33 }
 0x647   : > { %v1151_v23 = vsel %vm727_vm2, %v1148_v35, 0.0  ;;  %v1158_v24 = vsel %vm727_vm2, %v1149_v38, 0.0  ;;  %v1165_v25 = vsel %vm882_vm7, %v1150_v39, 0.0 }
 0x648   : > { %v1152_v26 = vrot.slane %v1151_v23, 4  ;;  %v1159_v30 = vrot.slane %v1158_v24, 4  ;;  %v1166_v32 = vrot.slane %v1165_v25, 4 }
 0x64a   : > { %v1153_v40 = vadd.f32 %v1152_v26, %v1151_v23  ;;  %v1160_v43 = vadd.f32 %v1159_v30, %v1158_v24  ;;  %v1167_v44 = vadd.f32 %v1166_v32, %v1165_v25 }
 0x64c   : > { %v1154_v45 = vrot.slane %v1153_v40, 2  ;;  %v1161_v47 = vrot.slane %v1160_v43, 2  ;;  %v1168_v48 = vrot.slane %v1167_v44, 2 }
 0x64e   : > { %v1155_v50 = vadd.f32 %v1154_v45, %v1153_v40  ;;  %v1162_v51 = vadd.f32 %v1161_v47, %v1160_v43  ;;  %v1169_v53 = vadd.f32 %v1168_v48, %v1167_v44 }
 0x650   : > { %v1156_v56 = vrot.slane %v1155_v50, 1  ;;  %v1163_v57 = vrot.slane %v1162_v51, 1  ;;  %v1170_v58 = vrot.slane %v1169_v53, 1 }
 0x652   : > { %v1157_v59 = vadd.f32 %v1156_v56, %v1155_v50  ;;  %v1164_v60 = vadd.f32 %v1163_v57, %v1162_v51  ;;  %v1171_v61 = vadd.f32 %v1170_v58, %v1169_v53 }
 0x654   : > { %v1182_v0 = vadd.f32 %v1181_v62, %v1157_v59  ;;  %v1183_v2 = vadd.f32 %v1181_v62, %v1164_v60  ;;  %v1184_v3 = vadd.f32 %v1181_v62, %v1171_v61 }
 0x656   : > { %v1185_v63 = vmul.f32 %v3464_v31, %v1182_v0  ;;  %v1186_v4 = vmul.f32 %v3474_v37, %v1183_v2  ;;  %v1187_v55 = vmul.f32 %v3469_v36, %v1184_v3 }
 0x658   : > { %v1188_v5 = vadd.f32 %v1186_v4, %v1185_v63  ;;  %v1190_v7 = vsel %vm1189_vm15, %v1187_v55, 0.0 }
 0x65a   : > { %v1191_v8 = vadd.f32 %v1190_v7, %v1188_v5 }
 0x65c   : > { %1192 = vadd.xlane.f32.xlu1 %v1191_v8 }
 0x66d   : > { %1258 = vrot.lane.b32.xlu1 %v3507_v42, %s2921_s14 }
 0x6e9   : > { %v1193_v9 = vpop.xlane.xlu1 %1192 }
 0x6ea   : > { %v1194_v10 = vmul.f32 0.00390625, %v1193_v9 }
 0x6ec   : > { %v1195_v11 = vsub.f32 %v1182_v0, %v1194_v10  ;;  %v1196_v12 = vsub.f32 %v1183_v2, %v1194_v10  ;;  %v1197_v13 = vsub.f32 %v1184_v3, %v1194_v10 }
 0x6ed   : > { %v1259_v35 = vpop.permute.xlu1 %1258 }
 0x6ee   : > { %v1198_v14 = vmul.f32 %v3464_v31, %v1195_v11  ;;  %v1199_v15 = vmul.f32 %v3474_v37, %v1196_v12  ;;  %v1200_v16 = vmul.f32 %v3469_v36, %v1197_v13 }
 0x6f0   : > { %v1201_v17 = vmul.f32 %v1198_v14, %v1198_v14  ;;  %v1202_v18 = vmul.f32 %v1199_v15, %v1199_v15  ;;  %v1203_v19 = vmul.f32 %v1200_v16, %v1200_v16 }
 0x6f2   : > { %v1204_v20 = vadd.f32 %v1202_v18, %v1201_v17  ;;  %v1205_v21 = vsel %vm1189_vm15, %v1203_v19, 0.0  ;;  %vm4006_vm15 = vmmov %vm4004_vm13 }
 0x6f4   : > { %v1206_v22 = vadd.f32 %v1205_v21, %v1204_v20 }
 0x6f6   : > { %1207 = vadd.xlane.f32.xlu0 %v1206_v22 }
 0x70c   : > { %1256 = vrot.lane.b32.xlu0 %v3513_v46, %s2921_s14 }
 0x710   : > { %1254 = vrot.lane.b32.xlu0 %v3505_v41, %s2921_s14 }
 0x783   : > { %v1208_v42 = vpop.xlane.xlu0 %1207 }
 0x784   : > { %v1209_v33 = vmul.f32 0.00390625, %v1208_v42 }
 0x786   : > { %v1210_v34 = vadd.f32 1e-05, %v1209_v33 }
 0x787   : > { %v1257_v38 = vpop.permute.xlu0 %1256 }
 0x788   : > { %2476 = vrsqrt.f32 %v1210_v34  ;;  %v1262_v39 = vsel %vm1244_vm8, %v1257_v38, %v1259_v35  ;;  %v1233_v35 = vunpack.c.l.bf16 %v3483_v52 }
 0x789   : > { %v3569_v23 = vsel %vm1266_vm9, %v1262_v39, 0 }
 0x78a   : > { %v1273_v24 = vrot.slane %v3569_v23, 6  ;;  %v1284_v48 = vrot.slane %v3569_v23, 4  ;;  %v1295_v53 = vrot.slane %v3569_v23, 2 }
 0x78b   : > { %v1255_v25 = vpop.permute.xlu0 %1254 }
 0x78c   : > { %v3573_v46 = vsel %vm1244_vm8, %v1255_v25, %v1257_v38  ;;  %1278 = vrot.lane.b32.xlu0 %v1273_v24, %s2910_s22  ;;  %v3579_v30 = vsel %vm1244_vm8, 0, %v1255_v25  ;;  %v1234_v38 = vunpack.c.h.bf16 %v3483_v52 }
 0x78d   : > { %v1272_v41 = vrot.slane %v3573_v46, 6  ;;  %v1283_v26 = vrot.slane %v3573_v46, 4  ;;  %v1271_v32 = vrot.slane %v3579_v30, 6  ;;  %v1282_v43 = vrot.slane %v3579_v30, 4 }
 0x78e   : > { %v1294_v54 = vrot.slane %v3573_v46, 2  ;;  %v1293_v63 = vrot.slane %v3579_v30, 2 }
 0x78f   : > { %1276 = vrot.lane.b32.xlu1 %v1272_v41, %s2910_s22 }
 0x790   : > { %1287 = vrot.lane.b32.xlu0 %v1283_v26, %s2911_s20 }
 0x792   : > { %v2477_v40 = vpop.eup %2476 }
 0x793   : > { %v1214_v44 = vmul.f32 %v2477_v40, %v1197_v13  ;;  %1274 = vrot.lane.b32.xlu1 %v1271_v32, %s2910_s22  ;;  %v1212_v45 = vmul.f32 %v2477_v40, %v1195_v11  ;;  %v1213_v47 = vmul.f32 %v2477_v40, %v1196_v12 }
 0x794   : > { %1285 = vrot.lane.b32.xlu0 %v1282_v43, %s2911_s20 }
 0x795   : > { %v2224_v49 = vmul.f32 -1.442695, %v1214_v44  ;;  %v2222_v50 = vmul.f32 -1.442695, %v1212_v45  ;;  %v2223_v51 = vmul.f32 -1.442695, %v1213_v47 }
 0x797   : > { %2478 = vpow2.f32 %v2224_v49  ;;  %1289 = vrot.lane.b32.xlu1 %v1284_v48, %s2911_s20 }
 0x798   : > { %1300 = vrot.lane.b32.xlu0 %v1295_v53, %s2912_s5  ;;  %2480 = vpow2.f32 %v2222_v50 }
 0x799   : > { %2482 = vpow2.f32 %v2223_v51 }
 0x79b   : > { %1298 = vrot.lane.b32.xlu1 %v1294_v54, %s2912_s5 }
 0x79c   : > { %1306 = vrot.lane.b32.xlu0 %v3573_v46, %s2913_s15 }
 0x7a0   : > { %1314 = vrot.lane.b32.xlu0 %v1272_v41, %s2914_s3 }
 0x7a1   : > { %v2479_v56 = vpop.eup %2478 }
 0x7a2   : > { %v2481_v57 = vpop.eup %2480  ;;  %v1226_v58 = vadd.f32 1.0, %v2479_v56 }
 0x7a3   : > { %v2483_v59 = vpop.eup %2482  ;;  %v1224_v60 = vadd.f32 1.0, %v2481_v57 }
 0x7a4   : > { %1304 = vrot.lane.b32.xlu0 %v3579_v30, %s2913_s15  ;;  %2484 = vrcp.f32 %v1226_v58  ;;  %v1225_v61 = vadd.f32 1.0, %v2483_v59 }
 0x7a5   : > { %2486 = vrcp.f32 %v1224_v60 }
 0x7a6   : > { %2488 = vrcp.f32 %v1225_v61 }
 0x7a8   : > { %1322 = vrot.lane.b32.xlu0 %v1283_v26, %s2915_s12 }
 0x7ac   : > { %1320 = vrot.lane.b32.xlu0 %v1282_v43, %s2915_s12 }
 0x7ae   : > { %v2485_v62 = vpop.eup %2484 }
 0x7af   : > { %v2487_v0 = vpop.eup %2486  ;;  %1241 = vrot.lane.b32.xlu1 %v2485_v62, %s2921_s14 }
 0x7b0   : > { %v2489_v2 = vpop.eup %2488  ;;  %1332 = vrot.lane.b32.xlu0 %v1295_v53, %s2916_s27 }
 0x7b1   : > { %v1238_v3 = vcombine.low %v2487_v0, %v2489_v2 }
 0x7b3   : > { %1239 = vrot.lane.b32.xlu1 %v1238_v3, %s2921_s14 }
 0x7b4   : > { %1328 = vrot.lane.b32.xlu0 %v1293_v63, %s2916_s27 }
 0x7b7   : > { %1296 = vrot.lane.b32.xlu1 %v1293_v63, %s2912_s5 }
 0x7b8   : > { %1340 = vrot.lane.b32.xlu0 %v3569_v23, %s2919_s0 }
 0x7bb   : > { %1308 = vrot.lane.b32.xlu1 %v3569_v23, %s2913_s15 }
 0x7bf   : > { %1316 = vrot.lane.b32.xlu1 %v1273_v24, %s2914_s3 }
 0x7c3   : > { %1312 = vrot.lane.b32.xlu1 %v1271_v32, %s2914_s3 }
 0x7c7   : > { %1324 = vrot.lane.b32.xlu1 %v1284_v48, %s2915_s12 }
 0x7cb   : > { %1330 = vrot.lane.b32.xlu1 %v1294_v54, %s2916_s27 }
 0x7cf   : > { %1338 = vrot.lane.b32.xlu1 %v3573_v46, %s2919_s0 }
 0x7d3   : > { %1336 = vrot.lane.b32.xlu1 %v3579_v30, %s2919_s0 }
 0x7fe   : > { %v1279_v4 = vpop.permute.xlu0 %1278 }
 0x7ff   : > { %v1350_v9 = vsel %vm955_vm11, %v3569_v23, %v1279_v4 }
 0x801   : > { %v1277_v55 = vpop.permute.xlu1 %1276 }
 0x802   : > { %v1288_v5 = vpop.permute.xlu0 %1287  ;;  %v1281_v11 = vsel %vm3963_vm1, %v1277_v55, %v1279_v4 }
 0x803   : > { %v1348_v16 = vsel %vm955_vm11, %v3573_v46, %v1281_v11 }
 0x805   : > { %v1275_v7 = vpop.permute.xlu1 %1274 }
 0x806   : > { %v1286_v8 = vpop.permute.xlu0 %1285  ;;  %v1280_v33 = vsel %vm3963_vm1, %v1275_v7, %v1277_v55 }
 0x807   : > { %v1345_v24 = vsel %vm955_vm11, %v3579_v30, %v1280_v33  ;;  %v1291_v25 = vsel %vm4005_vm14, %v1286_v8, %v1288_v5  ;;  %vm4009_vm14 = vcmask 752640  }
 0x808   : > { %v1352_v43 = vsel %vm727_vm2, %v1345_v24, %v1291_v25 }
 0x809   : > { %v1290_v10 = vpop.permute.xlu1 %1289 }
 0x80a   : > { %v1356_v12 = vsel %vm727_vm2, %v1350_v9, %v1290_v10  ;;  %v1301_v13 = vpop.permute.xlu0 %1300  ;;  %v1292_v14 = vsel %vm4003_vm12, %v1288_v5, %v1290_v10  ;;  %vm4007_vm12 = vcmask 883712  }
 0x80b   : > { %v1365_v15 = vsel %vm1357_vm10, %v1356_v12, %v1301_v13  ;;  %v1354_v19 = vsel %vm727_vm2, %v1348_v16, %v1292_v14 }
 0x80c   : > { %2273 = vmatpush3.bf16.msra.mxu1 %v1365_v15 }
 0x80d   : > { %v1299_v17 = vpop.permute.xlu1 %1298  ;;  %2274 = vmatprep.subr.bf16.mxu1 %v2909_v1 }
 0x80e   : > { %v1303_v18 = vsel %vm4004_vm13, %v1299_v17, %v1301_v13  ;;  %v1307_v21 = vpop.permute.xlu0 %1306  ;;  %vm4008_vm13 = vmmov %vm4007_vm12 }
 0x80f   : > { %v1362_v20 = vsel %vm1357_vm10, %v1354_v19, %v1303_v18 }
 0x810   : > { %1573 = vmatprep.subr.bf16.mxu0 %v1362_v20 }
 0x812   : > { %v1315_v22 = vpop.permute.xlu0 %1314 }
 0x816   : > { %v1305_v34 = vpop.permute.xlu0 %1304 }
 0x817   : > { %v1310_v0 = vsel %vm688_vm5, %v1305_v34, %v1307_v21  ;;  %v1555_v34 = vld [vmem:[#allocation17] sm:$0xf] }
 0x81a   : > { %v1323_v45 = vpop.permute.xlu0 %1322 }
 0x81e   : > { %v1321_v56 = vpop.permute.xlu0 %1320 }
 0x821   : > { %v1242_v42 = vpop.permute.xlu1 %1241 }
 0x822   : > { %v1333_v60 = vpop.permute.xlu0 %1332 }
 0x825   : > { %v1240_v39 = vpop.permute.xlu1 %1239 }
 0x826   : > { %v1243_v23 = vrot.slane %v1240_v39, 4  ;;  %v1329_v11 = vpop.permute.xlu0 %1328 }
 0x828   : > { %v1245_v46 = vsel %vm1244_vm8, %v1243_v23, %v1240_v39  ;;  %v1246_v41 = vsel %vm1244_vm8, %v1243_v23, %v1242_v42 }
 0x829   : > { %v1249_v26 = vmul.f32 %v1245_v46, %v1233_v35  ;;  %v1250_v32 = vmul.f32 %v1246_v41, %v1234_v38  ;;  %v1297_v40 = vpop.permute.xlu1 %1296 }
 0x82a   : > { %v1302_v44 = vsel %vm4006_vm15, %v1297_v40, %v1299_v17  ;;  %vm4010_vm15 = vmmov %vm4009_vm14  ;;  %v1341_v38 = vpop.permute.xlu0 %1340 }
 0x82b   : > { %v1394_v52 = vpack.c.bf16 %v1249_v26, %v1249_v26  ;;  %v1396_v47 = vpack.c.bf16 %v1250_v32, %v1250_v32  ;;  %v1359_v48 = vsel %vm1357_vm10, %v1352_v43, %v1302_v44  ;;  %v1392_v49 = vcombine.high %v1249_v26, %v1249_v26 }
 0x82c   : > { %1574 = vmatpush1.bf16.msra.mxu0 %v1359_v48  ;;  %v1326_v8 = vsel %vm4010_vm15, %v1321_v56, %v1323_v45 }
 0x82d   : > { %v3642_v30 = vsel %vm1244_vm8, 0, %v1394_v52  ;;  %v1309_v50 = vpop.permute.xlu1 %1308  ;;  %v3645_v51 = vsel %vm1266_vm9, %v1396_v47, 0  ;;  %v3651_v53 = vpack.c.bf16 %v1392_v49, %v1392_v49 }
 0x82e   : > { %1441 = vrot.lane.b32.xlu0 %v3645_v51, %s2913_s15  ;;  %1437 = vrot.lane.b32.xlu1 %v3642_v30, %s2913_s15  ;;  %v1426_v54 = vrot.slane %v3642_v30, 2  ;;  %v1406_v58 = vrot.slane %v3645_v51, 6  ;;  %v1404_v62 = vrot.slane %v3642_v30, 6  ;;  %v1311_v9 = vsel %vm688_vm5, %v1307_v21, %v1309_v50 }
 0x82f   : > { %v1417_v10 = vrot.slane %v3645_v51, 4  ;;  %v1415_v20 = vrot.slane %v3642_v30, 4  ;;  %v1428_v21 = vrot.slane %v3645_v51, 2  ;;  %v1416_v42 = vrot.slane %v3651_v53, 4 }
 0x830   : > { %v1427_v33 = vrot.slane %v3651_v53, 2 }
 0x831   : > { %v1317_v57 = vpop.permute.xlu1 %1316 }
 0x832   : > { %1429 = vrot.lane.b32.xlu0 %v1426_v54, %s2912_s5  ;;  %1439 = vrot.lane.b32.xlu1 %v3651_v53, %s2913_s15  ;;  %v1375_v2 = vsel %vm955_vm11, %v1309_v50, %v1317_v57  ;;  %v1319_v63 = vsel %vm4008_vm13, %v1315_v22, %v1317_v57 }
 0x833   : > { %v1372_v12 = vsel %vm955_vm11, %v1311_v9, %v1319_v63 }
 0x835   : > { %v1313_v59 = vpop.permute.xlu1 %1312 }
 0x836   : > { %1449 = vrot.lane.b32.xlu0 %v1406_v58, %s2914_s3  ;;  %1411 = vrot.lane.b32.xlu1 %v1406_v58, %s2910_s22  ;;  %v1318_v61 = vsel %vm4007_vm12, %v1313_v59, %v1315_v22  ;;  %vm4011_vm12 = vcmask 744448   ;;  %v1405_v22 = vrot.slane %v3651_v53, 6 }
 0x837   : > { %v1369_v4 = vsel %vm955_vm11, %v1310_v0, %v1318_v61  ;;  %vm4012_vm13 = vmmov %vm4011_vm12 }
 0x838   : > { %v1377_v14 = vsel %vm727_vm2, %v1369_v4, %v1326_v8 }
 0x839   : > { %v1325_v3 = vpop.permute.xlu1 %1324 }
 0x83a   : > { %v1381_v55 = vsel %vm727_vm2, %v1375_v2, %v1325_v3  ;;  %1445 = vrot.lane.b32.xlu0 %v1404_v62, %s2914_s3  ;;  %1407 = vrot.lane.b32.xlu1 %v1404_v62, %s2910_s22  ;;  %v1327_v5 = vsel %vm4009_vm14, %v1323_v45, %v1325_v3  ;;  %vm4013_vm14 = vcmask 1031168  }
 0x83b   : > { %v1389_v7 = vsel %vm1357_vm10, %v1381_v55, %v1333_v60  ;;  %v1379_v17 = vsel %vm727_vm2, %v1372_v12, %v1327_v5  ;;  %vm4014_vm15 = vmmov %vm4013_vm14 }
 0x83c   : > { %2275 = vmatpush3.bf16.msra.mxu1 %v1389_v7 }
 0x83d   : > { %v1331_v13 = vpop.permute.xlu1 %1330  ;;  %2276 = vmatprep.subr.bf16.mxu1 %v2909_v1 }
 0x83e   : > { %v1334_v15 = vsel %vm4011_vm12, %v1329_v11, %v1331_v13  ;;  %v1335_v16 = vsel %vm4012_vm13, %v1331_v13, %v1333_v60  ;;  %1457 = vrot.lane.b32.xlu0 %v1417_v10, %s2915_s12  ;;  %1422 = vrot.lane.b32.xlu1 %v1417_v10, %s2911_s20  ;;  %vm4015_vm12 = vcmask 883712   ;;  %vm4016_vm13 = vcmask 900096  }
 0x83f   : > { %v1386_v18 = vsel %vm1357_vm10, %v1379_v17, %v1335_v16  ;;  %v1383_v19 = vsel %vm1357_vm10, %v1377_v14, %v1334_v15 }
 0x840   : > { %1575 = vmatprep.subr.bf16.mxu0 %v1386_v18 }
 0x841   : > { %1576 = vmatpush1.bf16.msra.mxu0 %v1383_v19  ;;  %v1339_v35 = vpop.permute.xlu1 %1338 }
 0x842   : > { %1453 = vrot.lane.b32.xlu0 %v1415_v20, %s2915_s12  ;;  %1418 = vrot.lane.b32.xlu1 %v1415_v20, %s2911_s20 }
 0x845   : > { %v1337_v39 = vpop.permute.xlu1 %1336 }
 0x846   : > { %1433 = vrot.lane.b32.xlu1 %v1428_v21, %s2912_s5  ;;  %1409 = vrot.lane.b32.xlu0 %v1405_v22, %s2910_s22 }
 0x84a   : > { %1447 = vrot.lane.b32.xlu1 %v1405_v22, %s2914_s3  ;;  %1420 = vrot.lane.b32.xlu0 %v1416_v42, %s2911_s20 }
 0x84e   : > { %1455 = vrot.lane.b32.xlu1 %v1416_v42, %s2915_s12  ;;  %1431 = vrot.lane.b32.xlu0 %v1427_v33, %s2912_s5 }
 0x852   : > { %1463 = vrot.lane.b32.xlu1 %v1427_v33, %s2916_s27  ;;  %1465 = vrot.lane.b32.xlu0 %v1428_v21, %s2916_s27 }
 0x856   : > { %1461 = vrot.lane.b32.xlu1 %v1426_v54, %s2916_s27  ;;  %1469 = vrot.lane.b32.xlu0 %v3642_v30, %s2919_s0 }
 0x85a   : > { %1471 = vrot.lane.b32.xlu1 %v3651_v53, %s2919_s0  ;;  %1473 = vrot.lane.b32.xlu0 %v3645_v51, %s2919_s0 }
 0x85e   : > { %1558 = vperm.xlu1 %2465, %v1555_v34  }
 0x8a0   : > { %v1442_v23 = vpop.permute.xlu0 %1441  ;;  %v1438_v24 = vpop.permute.xlu1 %1437 }
 0x8a4   : > { %v1430_v25 = vpop.permute.xlu0 %1429  ;;  %v1440_v46 = vpop.permute.xlu1 %1439 }
 0x8a8   : > { %v1450_v41 = vpop.permute.xlu0 %1449  ;;  %v1412_v26 = vpop.permute.xlu1 %1411 }
 0x8a9   : > { %v1483_v47 = vsel %vm955_vm11, %v3645_v51, %v1412_v26  ;;  %v1504_v12 = vsel %vm955_vm11, %v1442_v23, %v1450_v41 }
 0x8ac   : > { %v1446_v32 = vpop.permute.xlu0 %1445  ;;  %v1408_v40 = vpop.permute.xlu1 %1407 }
 0x8b0   : > { %v1458_v43 = vpop.permute.xlu0 %1457  ;;  %v1423_v44 = vpop.permute.xlu1 %1422 }
 0x8b1   : > { %v1489_v48 = vsel %vm727_vm2, %v1483_v47, %v1423_v44  ;;  %v1510_v17 = vsel %vm727_vm2, %v1504_v12, %v1458_v43 }
 0x8b4   : > { %v1454_v45 = vpop.permute.xlu0 %1453  ;;  %v1419_v52 = vpop.permute.xlu1 %1418 }
 0x8b8   : > { %v1410_v49 = vpop.permute.xlu0 %1409  ;;  %v1434_v50 = vpop.permute.xlu1 %1433 }
 0x8b9   : > { %v1495_v54 = vsel %vm1357_vm10, %v1489_v48, %v1434_v50  ;;  %v1413_v57 = vsel %vm3963_vm1, %v1408_v40, %v1410_v49  ;;  %v1414_v61 = vsel %vm3963_vm1, %v1410_v49, %v1412_v26  ;;  %vm4019_vm1 = vcmask 736256  }
 0x8ba   : > { %v1526_v56 = vrot.slane %v1495_v54, 6  ;;  %v1478_v0 = vsel %vm955_vm11, %v3642_v30, %v1413_v57  ;;  %v1481_v2 = vsel %vm955_vm11, %v3651_v53, %v1414_v61  ;;  %v1343_v10 = vsel %vm4019_vm1, %v1339_v35, %v1341_v38 }
 0x8bb   : > { %v1444_v30 = vsel %vm688_vm5, %v1440_v46, %v1442_v23 }
 0x8bc   : > { %v1421_v58 = vpop.permute.xlu0 %1420  ;;  %v1448_v59 = vpop.permute.xlu1 %1447  ;;  %v1552_v60 = vsel %vm955_vm11, %v1341_v38, %v1526_v56 }
 0x8bd   : > { %v1424_v62 = vsel %vm4013_vm14, %v1419_v52, %v1421_v58  ;;  %2277 = vmatpush3.bf16.msra.mxu1 %v1552_v60  ;;  %v1425_v51 = vsel %vm4014_vm15, %v1421_v58, %v1423_v44  ;;  %v1452_v63 = vsel %vm4015_vm12, %v1448_v59, %v1450_v41  ;;  %vm4017_vm14 = vmmov %vm4016_vm13  ;;  %vm4018_vm15 = vcmask 752640  }
 0x8be   : > { %2278 = vmatprep.subr.bf16.mxu1 %v2909_v1  ;;  %v1485_v3 = vsel %vm727_vm2, %v1478_v0, %v1424_v62  ;;  %v1487_v5 = vsel %vm727_vm2, %v1481_v2, %v1425_v51  ;;  %v1501_v13 = vsel %vm955_vm11, %v1444_v30, %v1452_v63  ;;  %vm4020_vm12 = vmmov %vm4019_vm1  ;;  %vm4022_vm1 = vcmask 744448   ;;  %v1554_v51 = vld [vmem:[#allocation15] sm:$0x3] }
 0x8bf   : > { %v1342_v16 = vsel %vm4020_vm12, %v1337_v39, %v1339_v35  ;;  %v1443_v39 = vsel %vm688_vm5, %v1438_v24, %v1440_v46 }
 0x8c0   : > { %v1432_v4 = vpop.permute.xlu0 %1431  ;;  %v1456_v55 = vpop.permute.xlu1 %1455 }
 0x8c1   : > { %v1435_v7 = vsel %vm4016_vm13, %v1430_v25, %v1432_v4  ;;  %v1436_v8 = vsel %vm4017_vm14, %v1432_v4, %v1434_v50  ;;  %v1460_v9 = vsel %vm4018_vm15, %v1456_v55, %v1458_v43  ;;  %vm4021_vm13 = vcmask 883712   ;;  %vm4023_vm14 = vmmov %vm4018_vm15 }
 0x8c2   : > { %v1491_v53 = vsel %vm1357_vm10, %v1485_v3, %v1435_v7  ;;  %v1493_v11 = vsel %vm1357_vm10, %v1487_v5, %v1436_v8  ;;  %v1451_v18 = vsel %vm4021_vm13, %v1446_v32, %v1448_v59  ;;  %v1508_v19 = vsel %vm727_vm2, %v1501_v13, %v1460_v9  ;;  %vm4024_vm15 = vmmov %vm4022_vm1 }
 0x8c3   : > { %v1524_v14 = vrot.slane %v1491_v53, 6  ;;  %v1525_v15 = vrot.slane %v1493_v11, 6  ;;  %v1459_v38 = vsel %vm4023_vm14, %v1454_v45, %v1456_v55  ;;  %v1498_v41 = vsel %vm955_vm11, %v1443_v39, %v1451_v18  ;;  %vm4025_vm13 = vmmov %vm4020_vm12 }
 0x8c4   : > { %v1466_v20 = vpop.permute.xlu0 %1465  ;;  %v1464_v21 = vpop.permute.xlu1 %1463  ;;  %v1506_v43 = vsel %vm727_vm2, %v1498_v41, %v1459_v38 }
 0x8c5   : > { %v1516_v22 = vsel %vm1357_vm10, %v1510_v17, %v1466_v20  ;;  %v1468_v42 = vsel %vm4022_vm1, %v1464_v21, %v1466_v20  ;;  %v1548_v33 = vsel %vm955_vm11, %v1343_v10, %v1525_v15  ;;  %v1544_v34 = vsel %vm955_vm11, %v1342_v16, %v1524_v14 }
 0x8c6   : > { %v1531_v23 = vrot.slane %v1516_v22, 6  ;;  %v1514_v35 = vsel %vm1357_vm10, %v1508_v19, %v1468_v42  ;;  %1577 = vmatprep.subr.bf16.mxu0 %v1548_v33  ;;  %vm4026_vm1 = vcmask 588800  }
 0x8c7   : > { %v1529_v25 = vrot.slane %v1514_v35, 6  ;;  %1578 = vmatpush1.bf16.msra.mxu0 %v1544_v34  ;;  %vm4027_vm14 = vmmov %vm4026_vm1 }
 0x8c8   : > { %v1470_v26 = vpop.permute.xlu0 %1469  ;;  %v1462_v32 = vpop.permute.xlu1 %1461  ;;  %v1532_v40 = vsel %vm955_vm11, %v1526_v56, %v1531_v23 }
 0x8c9   : > { %v1467_v44 = vsel %vm4024_vm15, %v1462_v32, %v1464_v21  ;;  %2279 = vmatpush3.bf16.msra.mxu1 %v1532_v40  ;;  %v1530_v45 = vsel %vm955_vm11, %v1525_v15, %v1529_v25 }
 0x8ca   : > { %v1512_v52 = vsel %vm1357_vm10, %v1506_v43, %v1467_v44  ;;  %1579 = vmatprep.subr.bf16.mxu0 %v1530_v45  ;;  %2280 = vmatprep.subr.bf16.mxu1 %v2909_v1 }
 0x8cb   : > { %v1527_v24 = vrot.slane %v1512_v52, 6 }
 0x8cc   : > { %v1474_v46 = vpop.permute.xlu0 %1473  ;;  %v1472_v47 = vpop.permute.xlu1 %1471 }
 0x8cd   : > { %v1537_v48 = vrot.slane %v1474_v46, 6  ;;  %v1475_v49 = vsel %vm4020_vm12, %v1470_v26, %v1472_v47  ;;  %v1476_v50 = vsel %vm4025_vm13, %v1472_v47, %v1474_v46  ;;  %v1528_v54 = vsel %vm955_vm11, %v1524_v14, %v1527_v24 }
 0x8ce   : > { %v1533_v56 = vrot.slane %v1475_v49, 6  ;;  %v1535_v57 = vrot.slane %v1476_v50, 6  ;;  %1580 = vmatpush1.bf16.msra.mxu0 %v1528_v54 }
 0x8cf   : > { %v1538_v58 = vsel %vm955_vm11, %v1531_v23, %v1537_v48 }
 0x8d0   : > { %v1536_v59 = vsel %vm955_vm11, %v1529_v25, %v1535_v57  ;;  %v1571_v60 = vsel %vm727_vm2, %v1538_v58, 0  ;;  %v1534_v61 = vsel %vm955_vm11, %v1527_v24, %v1533_v56 }
 0x8d1   : > { %2225 = vmatprep.subr.msk.bf16.mxu0 %vm727_vm2, %v1536_v59  ;;  %2281 = vmatpush3.bf16.msra.mxu1 %v1571_v60  ;;  %v1565_v62 = vsel %vm727_vm2, %v1534_v61, 0 }
 0x8d2   : > { %1582 = vmatpush1.bf16.msra.mxu0 %v1565_v62  ;;  %2286 = vmatprep.subr.bf16.mxu1 %v2909_v1 }
 0x8d4   : > { %2283 = vmatmul.mubr.msk.bf16.vlgmr.msra.gmra.mrb[8].mxu1 %vm4026_vm1, %v1554_v51  ;;  %vm4031_vm1 = vcmask 900096  }
 0x8d5   : > { %2226 = vmatmul.mubr.msk.bf16.vlgmr.msra.gmra.mrb[8].mxu0 %vm4027_vm14, %v1554_v51  ;;  %2292 = vmatprep.mubr.msk.bf16.mxu1 %vm2918_vm0, %v2909_v1 }
 0x8d6   : > { %1890 = vmatprep.mubr.bf16.mxu0 %v2917_v6 }
 0x8dd   : > { %v1559_v0 = vpop.permute.xlu1 %1558 }
 0x9a7   : > { %v1648_v2 = vpop.f32.mrb[8].mxu1 }
 0x9a8   : > { %v1649_v3 = vadd.f32 %v1648_v2, %v1559_v0  ;;  %v1607_v63 = vpop.f32.mrb[8].mxu0  ;;  %v2284_v4 = vpop.f32.mrb[9].mxu1 }
 0x9a9   : > { %v1608_v55 = vadd.f32 %v1607_v63, %v1559_v0  ;;  %v1609_v5 = vpop.f32.mrb[9].mxu0  ;;  %v1651_v7 = vpop.f32.mrb[10].mxu1 }
 0x9aa   : > { %v1610_v8 = vadd.f32 %v1609_v5, %v1559_v0  ;;  %v1611_v9 = vpop.f32.mrb[10].mxu0  ;;  %v2285_v10 = vpop.f32.mrb[11].mxu1  ;;  %v1656_v11 = vmul.f32 %v3469_v36, %v1649_v3 }
 0x9ab   : > { %v1654_v30 = vmul.f32 %v3464_v31, %v1608_v55  ;;  %v1612_v53 = vpop.f32.mrb[11].mxu0 }
 0x9ac   : > { %v1655_v12 = vmul.f32 %v3474_v37, %v1610_v8  ;;  %v1660_v15 = vsel %vm882_vm7, %v1656_v11, 0.0 }
 0x9ad   : > { %v1657_v6 = vsel %vm727_vm2, %v1654_v30, 0.0 }
 0x9ae   : > { %v1658_v13 = vsel %vm727_vm2, %v1655_v12, 0.0  ;;  %v1839_v12 = vld [vmem:[#allocation20] sm:$0xf] }
 0x9af   : > { %v1659_v14 = vadd.f32 %v1658_v13, %v1657_v6 }
 0x9b1   : > { %v1661_v16 = vadd.f32 %v1660_v15, %v1659_v14 }
 0x9b3   : > { %1662 = vadd.xlane.f32.xlu0 %v1661_v16 }
 0xa40   : > { %v1663_v17 = vpop.xlane.xlu0 %1662 }
 0xa41   : > { %v1664_v18 = vmul.f32 0.00390625, %v1663_v17 }
 0xa43   : > { %v1665_v19 = vsub.f32 %v1608_v55, %v1664_v18  ;;  %v1666_v20 = vsub.f32 %v1610_v8, %v1664_v18  ;;  %v1667_v21 = vsub.f32 %v1649_v3, %v1664_v18 }
 0xa45   : > { %v1668_v22 = vmul.f32 %v3464_v31, %v1665_v19  ;;  %v1669_v42 = vmul.f32 %v3474_v37, %v1666_v20  ;;  %v1670_v33 = vmul.f32 %v3469_v36, %v1667_v21 }
 0xa47   : > { %v1671_v34 = vmul.f32 %v1668_v22, %v1668_v22  ;;  %v1672_v38 = vmul.f32 %v1669_v42, %v1669_v42  ;;  %v1673_v23 = vmul.f32 %v1670_v33, %v1670_v33 }
 0xa49   : > { %v1674_v35 = vsel %vm727_vm2, %v1671_v34, 0.0  ;;  %v1675_v39 = vsel %vm727_vm2, %v1672_v38, 0.0  ;;  %v1677_v41 = vsel %vm882_vm7, %v1673_v23, 0.0 }
 0xa4a   : > { %v1676_v25 = vadd.f32 %v1675_v39, %v1674_v35 }
 0xa4c   : > { %v1678_v26 = vadd.f32 %v1677_v41, %v1676_v25 }
 0xa4e   : > { %1679 = vadd.xlane.f32.xlu1 %v1678_v26 }
 0xadb   : > { %v1680_v32 = vpop.xlane.xlu1 %1679 }
 0xadc   : > { %v1681_v40 = vmul.f32 0.00390625, %v1680_v32 }
 0xade   : > { %v1682_v43 = vadd.f32 1e-05, %v1681_v40 }
 0xae0   : > { %2490 = vrsqrt.f32 %v1682_v43 }
 0xaea   : > { %v2491_v44 = vpop.eup %2490 }
 0xaeb   : > { %v1686_v45 = vmul.f32 %v2491_v44, %v1667_v21  ;;  %v1685_v52 = vmul.f32 %v2491_v44, %v1666_v20  ;;  %v1684_v24 = vmul.f32 %v2491_v44, %v1665_v19 }
 0xaed   : > { %vm1689_vm0 = vcmp.ge.f32.partialorder %v1686_v45, 0.0  ;;  %v1692_v46 = vmul.f32 0.25, %v1686_v45  ;;  %vm1688_vm15 = vcmp.ge.f32.partialorder %v1685_v52, 0.0  ;;  %v1691_v47 = vmul.f32 0.25, %v1685_v52 }
 0xaee   : > { %vm1687_vm12 = vcmp.ge.f32.partialorder %v1684_v24, 0.0  ;;  %v1690_v48 = vmul.f32 0.25, %v1684_v24 }
 0xaef   : > { %v1695_v49 = vsel %vm1689_vm0, %v1686_v45, %v1692_v46  ;;  %v1694_v50 = vsel %vm1688_vm15, %v1685_v52, %v1691_v47  ;;  %vm4033_vm0 = vcmask 883712   ;;  %vm4034_vm15 = vmmov %vm4031_vm1 }
 0xaf0   : > { %v3779_v54 = vsel %vm3453_vm4, %v1695_v49, 0.0  ;;  %v3783_v56 = vsel %vm3457_vm3, %v1694_v50, 0.0  ;;  %v1693_v57 = vsel %vm1687_vm12, %v1684_v24, %v1690_v48  ;;  %vm4035_vm12 = vmmov %vm4033_vm0 }
 0xaf1   : > { %v1702_v58 = vpack.c.bf16 %v3779_v54, %v3779_v54  ;;  %v1701_v59 = vpack.c.bf16 %v3783_v56, %v3783_v56  ;;  %v3791_v60 = vsel %vm3449_vm6, %v1693_v57, 0.0 }
 0xaf2   : > { %v1700_v61 = vpack.c.bf16 %v3791_v60, %v3791_v60 }
 0xaf3   : > { %1710 = vrot.lane.b32.xlu1 %v1702_v58, %s2921_s14  ;;  %1708 = vrot.lane.b32.xlu0 %v1701_v59, %s2921_s14 }
 0xaf7   : > { %1706 = vrot.lane.b32.xlu0 %v1700_v61, %s2921_s14 }
 0xb65   : > { %v1711_v62 = vpop.permute.xlu1 %1710  ;;  %v1709_v51 = vpop.permute.xlu0 %1708 }
 0xb66   : > { %v1713_v0 = vsel %vm1244_vm8, %v1709_v51, %v1711_v62 }
 0xb67   : > { %v1717_v2 = vsel %vm1266_vm9, %v1713_v0, 0  ;;  %vm4029_vm9 = vcmask 1031168  }
 0xb68   : > { %1757 = vrot.lane.b32.xlu1 %v1717_v2, %s2913_s15  ;;  %v1733_v30 = vrot.slane %v1717_v2, 4  ;;  %v1722_v53 = vrot.slane %v1717_v2, 6  ;;  %v1744_v11 = vrot.slane %v1717_v2, 2  ;;  %vm4032_vm14 = vmmov %vm4029_vm9 }
 0xb69   : > { %v1707_v3 = vpop.permute.xlu0 %1706 }
 0xb6a   : > { %v1712_v63 = vsel %vm1244_vm8, %v1707_v3, %v1709_v51  ;;  %v1715_v55 = vsel %vm1244_vm8, 0, %v1707_v3  ;;  %vm4028_vm8 = vcmask 1039360  }
 0xb6b   : > { %1755 = vrot.lane.b32.xlu0 %v1712_v63, %s2913_s15  ;;  %v1721_v4 = vrot.slane %v1712_v63, 6  ;;  %v1720_v5 = vrot.slane %v1715_v55, 6  ;;  %v1732_v7 = vrot.slane %v1712_v63, 4  ;;  %v1743_v8 = vrot.slane %v1712_v63, 2  ;;  %vm4030_vm13 = vmmov %vm4028_vm8 }
 0xb6c   : > { %v1731_v9 = vrot.slane %v1715_v55, 4  ;;  %v1742_v10 = vrot.slane %v1715_v55, 2 }
 0xb6d   : > { %1725 = vrot.lane.b32.xlu1 %v1721_v4, %s2910_s22 }
 0xb6f   : > { %1753 = vrot.lane.b32.xlu0 %v1715_v55, %s2913_s15 }
 0xb71   : > { %1723 = vrot.lane.b32.xlu1 %v1720_v5, %s2910_s22 }
 0xb73   : > { %1736 = vrot.lane.b32.xlu0 %v1732_v7, %s2911_s20 }
 0xb75   : > { %1747 = vrot.lane.b32.xlu1 %v1743_v8, %s2912_s5 }
 0xb77   : > { %1734 = vrot.lane.b32.xlu0 %v1731_v9, %s2911_s20 }
 0xb79   : > { %1745 = vrot.lane.b32.xlu1 %v1742_v10, %s2912_s5 }
 0xb7b   : > { %1763 = vrot.lane.b32.xlu0 %v1721_v4, %s2914_s3 }
 0xb7d   : > { %1761 = vrot.lane.b32.xlu1 %v1720_v5, %s2914_s3 }
 0xb7f   : > { %1771 = vrot.lane.b32.xlu0 %v1732_v7, %s2915_s12 }
 0xb81   : > { %1779 = vrot.lane.b32.xlu1 %v1743_v8, %s2916_s27 }
 0xb83   : > { %1769 = vrot.lane.b32.xlu0 %v1731_v9, %s2915_s12 }
 0xb85   : > { %1738 = vrot.lane.b32.xlu1 %v1733_v30, %s2911_s20  ;;  %s2806_s20 = scalar_lea.vmem %s3895_s30, 192 }
 0xb86   : > { %p2807_p5 = scmp.ne.s32.totalorder %s3895_s30, %s2806_s20 }
 0xb87   : > { %1727 = vrot.lane.b32.xlu0 %v1722_v53, %s2910_s22  ;;  %s3893_s22 = scalar_lea.hbm %s4042_s4, %s2308_s21 }
 0xb88   : > { %p2808_p0 = pnand %p2807_p5, %p4043_p9 }
 0xb89   : > { %1765 = vrot.lane.b32.xlu1 %v1722_v53, %s2914_s3 }
 0xb8a   : > { %p2809_p7 = pneg %p2808_p0 }
 0xb8b   : > { %1749 = vrot.lane.b32.xlu0 %v1744_v11, %s2912_s5  ;;  %s2922_s5 = smov [#allocation21]  }
 0xb8c   : > { %s2810_s15 = sshll.u32 %s2922_s5, 4  ;;  %s2811_s15 = int_to_ptr.vmem [resolvable:$false] %s2810_s15 }
 0xb8d   : > { %1773 = vrot.lane.b32.xlu1 %v1733_v30, %s2915_s12  ;;  %s2812_s3 = scalar_lea.vmem %s2811_s15, 384  ;;  %p2813_p11 = scmp.lt.s32.totalorder %s3895_s30, %s2811_s15 }
 0xb8e   : > { %p2814_p8 = scmp.lt.s32.totalorder %s2812_s3, %s2806_s20 }
 0xb8f   : > { %1781 = vrot.lane.b32.xlu0 %v1744_v11, %s2916_s27 }
 0xb90   : > { %p2815_p10 = por %p2814_p8, %p2813_p11 }
 0xb91   : > { %1777 = vrot.lane.b32.xlu1 %v1742_v10, %s2916_s27 }
 0xb92   : > { %p2816_p12 = pnand %p2815_p10, %p2809_p7 }
 0xb93   : > { %1785 = vrot.lane.b32.xlu0 %v1715_v55, %s2919_s0 }
 0xb95   : > { %1787 = vrot.lane.b32.xlu1 %v1712_v63, %s2919_s0 }
 0xb97   : > { %1789 = vrot.lane.b32.xlu0 %v1717_v2, %s2919_s0 }
 0xb99   : > { %1842 = vperm.xlu1 %2465, %v1839_v12  }
 0xbda   : > { %v1758_v6 = vpop.permute.xlu1 %1757 }
 0xbdd   : > { %v1756_v13 = vpop.permute.xlu0 %1755 }
 0xbde   : > { %v1760_v47 = vsel %vm688_vm5, %v1756_v13, %v1758_v6 }
 0xbdf   : > { %v1726_v14 = vpop.permute.xlu1 %1725 }
 0xbe1   : > { %v1754_v15 = vpop.permute.xlu0 %1753 }
 0xbe3   : > { %v1724_v16 = vpop.permute.xlu1 %1723 }
 0xbe4   : > { %v1729_v23 = vsel %vm4028_vm8, %v1724_v16, %v1726_v14  ;;  %vm4036_vm8 = vcmask 752640  }
 0xbe5   : > { %v1737_v17 = vpop.permute.xlu0 %1736  ;;  %v1794_v26 = vsel %vm955_vm11, %v1715_v55, %v1729_v23  ;;  %v1759_v55 = vsel %vm688_vm5, %v1754_v15, %v1756_v13  ;;  %vm4040_vm5 = vcmask 736256  }
 0xbe7   : > { %v1748_v18 = vpop.permute.xlu1 %1747 }
 0xbe9   : > { %v1735_v19 = vpop.permute.xlu0 %1734 }
 0xbea   : > { %v1740_v35 = vsel %vm4029_vm9, %v1735_v19, %v1737_v17  ;;  %vm4037_vm9 = vmmov %vm4036_vm8 }
 0xbeb   : > { %v1746_v20 = vpop.permute.xlu1 %1745  ;;  %v1801_v43 = vsel %vm727_vm2, %v1794_v26, %v1740_v35 }
 0xbec   : > { %v1751_v44 = vsel %vm4031_vm1, %v1746_v20, %v1748_v18 }
 0xbed   : > { %v1764_v21 = vpop.permute.xlu0 %1763  ;;  %v1807_v62 = vsel %vm1357_vm10, %v1801_v43, %v1751_v44 }
 0xbef   : > { %v1762_v22 = vpop.permute.xlu1 %1761 }
 0xbf0   : > { %v1767_v57 = vsel %vm4035_vm12, %v1762_v22, %v1764_v21 }
 0xbf1   : > { %v1772_v42 = vpop.permute.xlu0 %1771  ;;  %v1817_v8 = vsel %vm955_vm11, %v1759_v55, %v1767_v57 }
 0xbf3   : > { %v1780_v33 = vpop.permute.xlu1 %1779 }
 0xbf5   : > { %v1770_v34 = vpop.permute.xlu0 %1769 }
 0xbf6   : > { %v1775_v3 = vsel %vm4037_vm9, %v1770_v34, %v1772_v42 }
 0xbf7   : > { %v1739_v38 = vpop.permute.xlu1 %1738  ;;  %v1825_v30 = vsel %vm727_vm2, %v1817_v8, %v1775_v3 }
 0xbf8   : > { %v1741_v45 = vsel %vm4032_vm14, %v1737_v17, %v1739_v38  ;;  %vm4041_vm14 = vmmov %vm4040_vm5 }
 0xbf9   : > { %v1728_v39 = vpop.permute.xlu0 %1727 }
 0xbfa   : > { %v1730_v25 = vsel %vm4030_vm13, %v1726_v14, %v1728_v39  ;;  %v1799_v41 = vsel %vm955_vm11, %v1717_v2, %v1728_v39  ;;  %vm4038_vm13 = vcmask 744448  }
 0xbfb   : > { %v1797_v32 = vsel %vm955_vm11, %v1712_v63, %v1730_v25  ;;  %v1766_v40 = vpop.permute.xlu1 %1765  ;;  %v1805_v46 = vsel %vm727_vm2, %v1799_v41, %v1739_v38  ;;  %vm4039_vm1 = vmmov %vm4038_vm13 }
 0xbfc   : > { %v1768_v52 = vsel %vm4033_vm0, %v1764_v21, %v1766_v40  ;;  %v1803_v50 = vsel %vm727_vm2, %v1797_v32, %v1741_v45  ;;  %v1823_v58 = vsel %vm955_vm11, %v1758_v6, %v1766_v40  ;;  %vm1845_vm0 = vcmask 293888  }
 0xbfd   : > { %v1750_v24 = vpop.permute.xlu0 %1749  ;;  %v1820_v51 = vsel %vm955_vm11, %v1760_v47, %v1768_v52 }
 0xbfe   : > { %v1752_v48 = vsel %vm4034_vm15, %v1748_v18, %v1750_v24  ;;  %v1813_v49 = vsel %vm1357_vm10, %v1805_v46, %v1750_v24  ;;  %v1699_v18 = vld [vmem:[#allocation18] sm:$0x3] }
 0xbff   : > { %2287 = vmatpush3.bf16.msra.mxu1 %v1813_v49  ;;  %v1774_v59 = vpop.permute.xlu1 %1773  ;;  %v1810_v61 = vsel %vm1357_vm10, %v1803_v50, %v1752_v48 }
 0xc00   : > { %v1776_v0 = vsel %vm4036_vm8, %v1772_v42, %v1774_v59  ;;  %v1829_v2 = vsel %vm727_vm2, %v1823_v58, %v1774_v59  ;;  %1858 = vmatprep.subr.bf16.mxu0 %v1810_v61  ;;  %2288 = vmatprep.subr.bf16.mxu1 %v2909_v1 }
 0xc01   : > { %v1782_v63 = vpop.permute.xlu0 %1781  ;;  %1859 = vmatpush1.bf16.msra.mxu0 %v1807_v62  ;;  %v1827_v4 = vsel %vm727_vm2, %v1820_v51, %v1776_v0 }
 0xc02   : > { %v1784_v5 = vsel %vm4038_vm13, %v1780_v33, %v1782_v63  ;;  %v1837_v7 = vsel %vm1357_vm10, %v1829_v2, %v1782_v63 }
 0xc03   : > { %2289 = vmatpush3.bf16.msra.mxu1 %v1837_v7  ;;  %v1778_v9 = vpop.permute.xlu1 %1777  ;;  %v1834_v10 = vsel %vm1357_vm10, %v1827_v4, %v1784_v5 }
 0xc04   : > { %v1783_v53 = vsel %vm4039_vm1, %v1778_v9, %v1780_v33  ;;  %1860 = vmatprep.subr.bf16.mxu0 %v1834_v10  ;;  %2290 = vmatprep.subr.bf16.mxu1 %v2909_v1 }
 0xc05   : > { %v1786_v11 = vpop.permute.xlu0 %1785  ;;  %v1831_v12 = vsel %vm1357_vm10, %v1825_v30, %v1783_v53 }
 0xc06   : > { %1861 = vmatpush1.bf16.msra.mxu0 %v1831_v12 }
 0xc07   : > { %v1788_v6 = vpop.permute.xlu1 %1787 }
 0xc08   : > { %v1791_v13 = vsel %vm4040_vm5, %v1786_v11, %v1788_v6 }
 0xc09   : > { %v1790_v14 = vpop.permute.xlu0 %1789  ;;  %v1850_v17 = vsel %vm955_vm11, %v1791_v13, 0 }
 0xc0a   : > { %v1792_v15 = vsel %vm4041_vm14, %v1788_v6, %v1790_v14  ;;  %v1856_v16 = vsel %vm955_vm11, %v1790_v14, 0 }
 0xc0b   : > { %2228 = vmatprep.subr.msk.bf16.mxu0 %vm955_vm11, %v1792_v15  ;;  %2291 = vmatpush3.bf16.msra.mxu1 %v1856_v16 }
 0xc0c   : > { %1863 = vmatpush1.bf16.msra.mxu0 %v1850_v17 }
 0xc0e   : > { %2293 = vmatmul.mubr.msk.bf16.vlgmr.msra.gmra.mrb[12].mxu1 %vm1845_vm0, %v1699_v18 }
 0xc0f   : > { %2229 = vmatmul.mubr.msk.bf16.vlgmr.msra.gmra.mrb[12].mxu0 %vm1845_vm0, %v1699_v18 }
 0xc18   : > { %v1843_v1 = vpop.permute.xlu1 %1842 }
 0xce1   : > { %v1933_v19 = vpop.f32.mrb[12].mxu1 }
 0xce2   : > { %v1934_v20 = vadd.f32 %v1933_v19, %v1843_v1  ;;  %v1892_v21 = vpop.f32.mrb[12].mxu0  ;;  %v2294_v22 = vpop.f32.mrb[13].mxu1 }
 0xce3   : > { %v1893_v42 = vadd.f32 %v1892_v21, %v1843_v1  ;;  %v1894_v33 = vpop.f32.mrb[13].mxu0  ;;  %v1936_v34 = vpop.f32.mrb[14].mxu1 }
 0xce4   : > { %v1895_v38 = vadd.f32 %v1894_v33, %v1843_v1  ;;  %v1896_v23 = vpop.f32.mrb[14].mxu0  ;;  %v2295_v35 = vpop.f32.mrb[15].mxu1  ;;  %v1941_v41 = vmul.f32 %v3469_v36, %v1934_v20 }
 0xce5   : > { %v1939_v39 = vmul.f32 %v3464_v31, %v1893_v42  ;;  %v1897_v25 = vpop.f32.mrb[15].mxu0 }
 0xce6   : > { %v1940_v26 = vmul.f32 %v3474_v37, %v1895_v38  ;;  %v1945_v44 = vsel %vm882_vm7, %v1941_v41, 0.0 }
 0xce7   : > { %v1942_v32 = vsel %vm727_vm2, %v1939_v39, 0.0 }
 0xce8   : > { %v1943_v40 = vsel %vm727_vm2, %v1940_v26, 0.0 }
 0xce9   : > { %v1944_v43 = vadd.f32 %v1943_v40, %v1942_v32 }
 0xceb   : > { %v1946_v45 = vadd.f32 %v1945_v44, %v1944_v43 }
 0xced   : > { %1947 = vadd.xlane.f32.xlu0 %v1946_v45 }
 0xd7a   : > { %v1948_v52 = vpop.xlane.xlu0 %1947 }
 0xd7b   : > { %v1949_v24 = vmul.f32 0.00390625, %v1948_v52 }
 0xd7d   : > { %v1950_v46 = vsub.f32 %v1893_v42, %v1949_v24  ;;  %v1951_v47 = vsub.f32 %v1895_v38, %v1949_v24  ;;  %v1952_v48 = vsub.f32 %v1934_v20, %v1949_v24 }
 0xd7f   : > { %v1953_v49 = vmul.f32 %v3464_v31, %v1950_v46  ;;  %v1954_v50 = vmul.f32 %v3474_v37, %v1951_v47  ;;  %v1955_v57 = vmul.f32 %v3469_v36, %v1952_v48 }
 0xd81   : > { %v1956_v58 = vmul.f32 %v1953_v49, %v1953_v49  ;;  %v1957_v59 = vmul.f32 %v1954_v50, %v1954_v50  ;;  %v1958_v61 = vmul.f32 %v1955_v57, %v1955_v57 }
 0xd83   : > { %v1959_v62 = vsel %vm727_vm2, %v1956_v58, 0.0  ;;  %v1960_v51 = vsel %vm727_vm2, %v1957_v59, 0.0  ;;  %v1962_v2 = vsel %vm882_vm7, %v1958_v61, 0.0 }
 0xd84   : > { %v1961_v0 = vadd.f32 %v1960_v51, %v1959_v62 }
 0xd86   : > { %v1963_v3 = vadd.f32 %v1962_v2, %v1961_v0 }
 0xd88   : > { %1964 = vadd.xlane.f32.xlu1 %v1963_v3 }
 0xe15   : > { %v1965_v63 = vpop.xlane.xlu1 %1964 }
 0xe16   : > { %v1966_v4 = vmul.f32 0.00390625, %v1965_v63 }
 0xe18   : > { %v1967_v55 = vadd.f32 1e-05, %v1966_v4 }
 0xe1a   : > { %2492 = vrsqrt.f32 %v1967_v55 }
 0xe24   : > { %v2493_v31 = vpop.eup %2492 }
 0xe25   : > { %v1969_v37 = vmul.f32 %v2493_v31, %v1950_v46  ;;  %v1970_v36 = vmul.f32 %v2493_v31, %v1951_v47  ;;  %v1971_v5 = vmul.f32 %v2493_v31, %v1952_v48 }
 0xe27   : > { %vm1972_vm11 = vcmp.ge.f32.partialorder %v1969_v37, 0.0  ;;  %vm1973_vm10 = vcmp.ge.f32.partialorder %v1970_v36, 0.0  ;;  %vm1974_vm15 = vcmp.ge.f32.partialorder %v1971_v5, 0.0  ;;  %v1975_v7 = vmul.f32 0.25, %v1969_v37 }
 0xe28   : > { %v1976_v8 = vmul.f32 0.25, %v1970_v36  ;;  %v1977_v9 = vmul.f32 0.25, %v1971_v5 }
 0xe29   : > { %v1978_v10 = vsel %vm1972_vm11, %v1969_v37, %v1975_v7 }
 0xe2a   : > { %v1979_v30 = vsel %vm1973_vm10, %v1970_v36, %v1976_v8  ;;  %v1980_v53 = vsel %vm1974_vm15, %v1971_v5, %v1977_v9  ;;  %v1981_v11 = vsel %vm3449_vm6, %v1978_v10, 0.0 }
 0xe2b   : > { %v1982_v12 = vsel %vm3457_vm3, %v1979_v30, 0.0  ;;  %v1983_v6 = vsel %vm3453_vm4, %v1980_v53, 0.0  ;;  %v1984_v13 = vadd.f32 %v1981_v11, %v3791_v60 }
 0xe2c   : > { %v1985_v14 = vadd.f32 %v1982_v12, %v3783_v56  ;;  %v1986_v15 = vadd.f32 %v1983_v6, %v3779_v54 }
 0xe2e   : > { %v1989_v16 = vcombine.low %v1984_v13, %v1985_v14  ;;  %1992 = vst.msk [vmem:[%s581_s13 + $0x8] sm:$0xf] %vm882_vm7, %v1986_v15 }
 0xe30   : > { %1991 = vst [vmem:[%s581_s13] sm:$0xff] %v1989_v16 }
 0xe31   : > { %2819 = shalt.err (!%p2816_p12)
}
 0xe32   : > { %s2820_s19 = scalar_lea.hbm %s3893_s22, 192  ;;  %s2824_s0 = scalar_lea.hbm %s4042_s4, 384 }
 0xe33   : > { %p2821_p13 = scmp.ne.s32.totalorder %s3893_s22, %s2820_s19  ;;  %p2825_p2 = scmp.lt.u32.totalorder %s3893_s22, %s4042_s4 }
 0xe34   : > { %p2826_p6 = scmp.lt.u32.totalorder %s2824_s0, %s2820_s19  ;;  %p2828_p5 = scmp.lt.u32.totalorder %s2820_s19, %s3893_s22 }
 0xe35   : > { %p2822_p1 = pnand %p2821_p13, %p4043_p9 }
 0xe36   : > { %p2827_p4 = por %p2826_p6, %p2825_p2 }
 0xe37   : > { %p2823_p3 = pneg %p2822_p1 }
 0xe38   : > { %p2829_p0 = por %p2828_p5, %p2827_p4 }
 0xe3a   : > { %p2830_p7 = pnand %p2829_p0, %p2823_p3 }
 0xe3c   : > { %2833 = shalt.err (!%p2830_p7)
}
 0xe3d   : > { %2349 = dma.vmem_to_hbm [thread:$0]  (%p4043_p9), %s3895_s30, 192, %s3893_s22, %s1994_s2  }
 0xe3e PF: > { %s2020_s13 = sand.u32 1, %s2884_s23   ;;  %p4044_p11 = scmp.ne.s32.totalorder %s3981_s17, 0 }
 0xe3f   : > { %p4045_p8 = scmp.ge.s32.totalorder %s2896_s26, 2  ;;  %s2021_s28 = scalar_lea.sflag [#allocation5], %s2020_s13 }
 0xe41   : > { %p2387_p10 = pnand %p4045_p8, %p4044_p11 }
 0xe43   : > { %2879 = dma.done.wait (!%p2387_p10), %s2021_s28, 192  }
 0xe44   : > { %2881 = vsyncadd (!%p2387_p10), %s2021_s28, 4294967104  ;;  %p34_p12 = scmp.ge.s32.totalorder %s3224_s16, 4   ;;  %s4046_s23 = smov %s2888_s24 }
 0xe45   : > { %s4047_s24 = smov %s2892_s25  ;;  %s4048_s25 = smov %s3236_s29 }
 0xe46   : > { %s4049_s26 = smov %s3224_s16  ;;  %36 = sbr.rel (!%p34_p12) target bundleno = 18 (0x12), region = 162 }
 0xe4d   :  { %2026 = vsyncpa [#allocation4], 1 }
 0xe4e   :  { %2028 = vsyncpa [#allocation4 + $0x1], 1 }
 0xe4f   :  { %2029 = vsyncpa [#allocation7], 1 }
 0xe50   :  { %2031 = vsyncpa [#allocation7 + $0x1], 1 }
 0xe51   :  { %2032 = vsyncpa [#allocation10], 1 }
 0xe52   :  { %2033 = vsyncpa [#allocation13], 1 }
 0xe53   :  { %2034 = vsyncpa [#allocation16], 1 }
 0xe54   :  { %2035 = vsyncpa [#allocation19], 1 }
 0xe55   :  { %2036 = vsyncpa [#allocation5], 1 }
 0xe56   :  { %2038 = vsyncpa [#allocation5 + $0x1], 1 }

</bundles_post_ra>
